<compile_context>
chip_gen: v5e
topology: v5e:2x2
jax: 0.10.0
libtpu: 0.0.40
codegen_flags: <defaults>
</compile_context>

<pallas_src>
import functools

import jax
import jax.numpy as jnp
from jax import lax
from jax.experimental import pallas as pl
from jax.experimental.pallas import tpu as pltpu

BN_EPS = 1e-5
LANE = 128
# Safe under v7x's 64 MiB physical VMEM.
# TODO(synk): make this a per-generation budget (raise toward ~100 MiB on v5e/v6e).
DEFAULT_VMEM_LIMIT = 48 * 1024 * 1024


def _round_up(x, m):
    return (x + m - 1) // m * m


def _conv_stats_kernel(x_ref, w_ref, y_ref, sum_ref, ssq_ref, *, H, W, Cin):
    """Pass A: 3x3 conv for one zero-padded image + per-image channel stats.

    x_ref:   [H+2, W+2, Cin]    bf16 (one zero-padded image)
    w_ref:   [3, 3, Cin, Coutp] bf16
    y_ref:   [H*W, Coutp]       bf16 (conv-output stash, consumed by pass B)
    sum_ref: [1, Coutp]         f32  per-image sum over H*W
    ssq_ref: [1, Coutp]         f32  per-image sum of squares over H*W
    """
    HW = H * W
    acc = None
    # kw slices shift the sublane (W) axis -> materialized relayouts; hoist them
    # out of the kh loop so we pay 3 of them, not 9. The kh slice is a free
    # leading-dim view and the reshape is layout-preserving because W % 8 == 0.
    for kw in range(3):
        xk = x_ref[:, kw:kw + W, :]                       # (H+2, W, Cin)
        for kh in range(3):
            xv = xk[kh:kh + H].reshape(HW, Cin)           # pure view
            p = jnp.dot(xv, w_ref[kh, kw], preferred_element_type=jnp.float32)
            acc = p if acc is None else acc + p           # register-resident acc
    # TODO(synk): for small Cin, fold taps into the contraction (K = 3*Cin / 9*Cin
    # via a lane-concat strip) so the MXU is not fed K=Cin-deep pushes.
    y_ref[...] = acc.astype(y_ref.dtype)
    sum_ref[...] = jnp.sum(acc, axis=0, keepdims=True)
    # TODO(synk): E[y^2] - E[y]^2 cancels badly for large-mean activations; switch
    # to shifted / Welford-style accumulation if that regime matters.
    ssq_ref[...] = jnp.sum(acc * acc, axis=0, keepdims=True)


def _bn_relu_kernel(y_ref, scale_ref, shift_ref, sel_ref, o_ref):
    """Pass B: per-channel scale/shift + ReLU, stored directly as NCHW-flat.

    y_ref:     [H*W, Coutp]  bf16 (stash from pass A)
    scale_ref: [1, Coutp]    f32
    shift_ref: [1, Coutp]    f32
    sel_ref:   [Cout, Coutp] f32  one-hot channel selector
    o_ref:     [Cout, H*W]   f32
    """
    z = y_ref[...].astype(jnp.float32) * scale_ref[...] + shift_ref[...]
    z = jnp.maximum(z, 0.0)
    # (Cout, H*W) = sel @ z^T done as a q.k^T-style contraction on the MXU:
    # lane-dense stores, padded channels never leave VMEM, wrapper reshape is free.
    o_ref[...] = lax.dot_general(
        sel_ref[...], z, (((1,), (1,)), ((), ())),
        precision=lax.Precision.HIGHEST,
        preferred_element_type=jnp.float32)


def conv_unit_forward(x_nchw, w_oihw, conv_bias, gamma, beta,
                      *, vmem_limit_bytes=DEFAULT_VMEM_LIMIT):
    """ConvUnit forward (train-mode BatchNorm). [N,Cin,H,W] f32 -> [N,Cout,H,W] f32."""
    N, Cin, H, W = x_nchw.shape
    Cout = w_oihw.shape[0]
    # W % 8 keeps the in-kernel (H, W, Cin) -> (H*W, Cin) reshape a pure view.
    assert W % 8 == 0, "TODO(synk): pad/mask W to a multiple of 8 for general widths"
    Coutp = _round_up(Cout, LANE)          # lane-dense / MXU-friendly channel axis
    Hp, Wp = H + 2, W + 2
    HW = H * W
    M = N * HW
    # Conv bias is exactly cancelled by train-mode BN mean subtraction -> dead work.
    del conv_bias

    # ---- layout / pad / cast glue (plain JAX) ----
    # TODO(synk): in a full network keep activations NHWC bf16 end-to-end (and/or
    # handle the 1-px halo in-kernel) so these per-layer HBM passes disappear.
    x_nhwc = jnp.transpose(x_nchw.astype(jnp.bfloat16), (0, 2, 3, 1))
    x_pad = jnp.pad(x_nhwc, ((0, 0), (1, 1), (1, 1), (0, 0)))

    w_k = jnp.transpose(w_oihw, (2, 3, 1, 0))                         # (3,3,Cin,Cout)
    w_k = jnp.pad(w_k, ((0, 0), (0, 0), (0, 0), (0, Coutp - Cout))).astype(jnp.bfloat16)
    gpad = jnp.pad(gamma.astype(jnp.float32), (0, Coutp - Cout)).reshape(1, Coutp)
    bpad = jnp.pad(beta.astype(jnp.float32), (0, Coutp - Cout)).reshape(1, Coutp)
    sel = jnp.eye(Cout, Coutp, dtype=jnp.float32)                     # channel selector

    x_spec = pl.BlockSpec((None, Hp, Wp, Cin), lambda i: (i, 0, 0, 0))
    w_spec = pl.BlockSpec((3, 3, Cin, Coutp), lambda i: (0, 0, 0, 0))
    y_spec = pl.BlockSpec((None, HW, Coutp), lambda i: (i, 0, 0))
    row_spec = pl.BlockSpec((None, 1, Coutp), lambda i: (i, 0, 0))
    vec_spec = pl.BlockSpec((1, Coutp), lambda i: (0, 0))
    sel_spec = pl.BlockSpec((Cout, Coutp), lambda i: (0, 0))

    # TODO(synk): for large H*W tile H-strips with a 2-row halo (and batch several
    # tiny images per step); one image per step is fine for the shapes used here
    # and keeps both grid axes fully parallel.

    # ---- pass A: conv once, stash bf16 result, per-image channel stats ----
    y_stash, sums, ssq = pl.pallas_call(
        functools.partial(_conv_stats_kernel, H=H, W=W, Cin=Cin),
        out_shape=(jax.ShapeDtypeStruct((N, HW, Coutp), jnp.bfloat16),
                   jax.ShapeDtypeStruct((N, 1, Coutp), jnp.float32),
                   jax.ShapeDtypeStruct((N, 1, Coutp), jnp.float32)),
        grid_spec=pltpu.PrefetchScalarGridSpec(
            num_scalar_prefetch=0,
            grid=(N,),
            in_specs=[x_spec, w_spec],
            out_specs=(y_spec, row_spec, row_spec)),
        compiler_params=pltpu.CompilerParams(
            dimension_semantics=("parallel",),
            vmem_limit_bytes=vmem_limit_bytes),
    )(x_pad, w_k)

    # ---- fold BN (train-mode batch stats, biased variance) into scale/shift ----
    mean = jnp.sum(sums, axis=0) / M                                  # (1, Coutp)
    var = jnp.maximum(jnp.sum(ssq, axis=0) / M - mean * mean, 0.0)
    scale = gpad * lax.rsqrt(var + BN_EPS)
    shift = bpad - mean * scale

    # ---- pass B: scale/shift + ReLU epilogue, direct NCHW-flat f32 output ----
    out_flat = pl.pallas_call(
        _bn_relu_kernel,
        out_shape=jax.ShapeDtypeStruct((N, Cout, HW), jnp.float32),
        grid_spec=pltpu.PrefetchScalarGridSpec(
            num_scalar_prefetch=0,
            grid=(N,),
            in_specs=[y_spec, vec_spec, vec_spec, sel_spec],
            out_specs=pl.BlockSpec((None, Cout, HW), lambda i: (i, 0, 0))),
        compiler_params=pltpu.CompilerParams(
            dimension_semantics=("parallel",),
            vmem_limit_bytes=vmem_limit_bytes),
    )(y_stash, scale, shift, sel)

    return out_flat.reshape(N, Cout, H, W)    # metadata-only reshape


def reference_forward(x, w, cb, gamma, beta):
    """Pure-JAX reference: conv(+bias) -> BatchNorm2d(training batch stats) -> ReLU."""
    y = lax.conv_general_dilated(
        x, w, window_strides=(1, 1), padding=((1, 1), (1, 1)),
        dimension_numbers=("NCHW", "OIHW", "NCHW"),
    ) + cb.reshape(1, -1, 1, 1)
    mean = jnp.mean(y, axis=(0, 2, 3), keepdims=True)
    var = jnp.mean((y - mean) ** 2, axis=(0, 2, 3), keepdims=True)
    yn = (y - mean) * lax.rsqrt(var + BN_EPS) * gamma.reshape(1, -1, 1, 1) \
         + beta.reshape(1, -1, 1, 1)
    return jnp.maximum(yn, 0.0)


if __name__ == "__main__":
    key = jax.random.PRNGKey(0)
    k_x, k_w, k_b, k_g, k_be = jax.random.split(key, 5)

    N, Cin, H, W = 2, 4, 16, 16
    Cout = 8

    x = jax.random.normal(k_x, (N, Cin, H, W), dtype=jnp.float32)
    fan_in = Cin * 9
    bound = 1.0 / (fan_in ** 0.5)
    w = jax.random.uniform(k_w, (Cout, Cin, 3, 3), jnp.float32, -bound, bound)
    conv_bias = jax.random.uniform(k_b, (Cout,), jnp.float32, -bound, bound)
    gamma = jax.random.uniform(k_g, (Cout,), jnp.float32, 0.5, 1.5)
    beta = 0.1 * jax.random.normal(k_be, (Cout,), dtype=jnp.float32)

    out = jax.block_until_ready(conv_unit_forward(x, w, conv_bias, gamma, beta))
    assert out.shape == (N, Cout, H, W)

    # Reference 1: exact module semantics in f32.
    ref_f32 = reference_forward(x, w, conv_bias, gamma, beta)

    # Reference 2: mirror the kernel numerics (bf16 inputs/weights into the MXU,
    # f32 conv accumulation & stats, bf16 stash before the BN epilogue). Bias is
    # omitted because train-mode BN cancels it exactly.
    xq = x.astype(jnp.bfloat16).astype(jnp.float32)
    wq = w.astype(jnp.bfloat16).astype(jnp.float32)
    yl = lax.conv_general_dilated(xq, wq, (1, 1), ((1, 1), (1, 1)),
                                  dimension_numbers=("NCHW", "OIHW", "NCHW"))
    mean_l = jnp.mean(yl, axis=(0, 2, 3), keepdims=True)
    var_l = jnp.maximum(jnp.mean(yl * yl, axis=(0, 2, 3), keepdims=True)
                        - mean_l * mean_l, 0.0)
    scale_l = gamma.reshape(1, -1, 1, 1) * lax.rsqrt(var_l + BN_EPS)
    shift_l = beta.reshape(1, -1, 1, 1) - mean_l * scale_l
    ylq = yl.astype(jnp.bfloat16).astype(jnp.float32)
    ref_logic = jnp.maximum(ylq * scale_l + shift_l, 0.0)

    err_logic = float(jnp.max(jnp.abs(out - ref_logic)))   # ~bf16-stash ulps only
    err_total = float(jnp.max(jnp.abs(out - ref_f32)))     # + bf16 input rounding
    assert err_logic < 4e-2, f"kernel-logic mismatch vs bf16-matched reference: {err_logic}"
    assert err_total < 1e-1, f"mismatch vs exact f32 module semantics: {err_total}"

    print("KERNEL_OK")
</pallas_src>

<mosaic_0001>
module attributes {stable_mosaic.version = 11 : i64} {
  func.func @_conv_stats_kernel(%arg0: i32, %arg1: memref<1x18x18x4xbf16, #tpu.memory_space<vmem>>, %arg2: memref<3x3x4x128xbf16, #tpu.memory_space<vmem>>, %arg3: memref<1x256x128xbf16, #tpu.memory_space<vmem>>, %arg4: memref<1x1x128xf32, #tpu.memory_space<vmem>>, %arg5: memref<1x1x128xf32, #tpu.memory_space<vmem>>) attributes {dimension_semantics = [#tpu.dimension_semantics<parallel>], iteration_bounds = array<i64: 2>, scalar_prefetch = 0 : i64, scratch_operands = 0 : i64, tpu.core_type = #tpu.core_type<tc>, window_params = [{transform_indices = @transform_0, window_bounds = array<i64: 1, 18, 18, 4>}, {pipeline_mode = #tpu.pipeline_mode<synchronous>, transform_indices = @transform_1, window_bounds = array<i64: 3, 3, 4, 128>}, {transform_indices = @transform_2, window_bounds = array<i64: 1, 256, 128>}, {transform_indices = @transform_3, window_bounds = array<i64: 1, 1, 128>}, {transform_indices = @transform_4, window_bounds = array<i64: 1, 1, 128>}]} {
    %c0 = arith.constant 0 : index
    %c0_0 = arith.constant 0 : index
    %c0_1 = arith.constant 0 : index
    %c0_2 = arith.constant 0 : index
    %0 = vector.load %arg1[%c0, %c0_0, %c0_1, %c0_2] : memref<1x18x18x4xbf16, #tpu.memory_space<vmem>>, vector<1x18x16x4xbf16>
    %1 = vector.shape_cast %0 : vector<1x18x16x4xbf16> to vector<18x16x4xbf16>
    %2 = vector.extract_strided_slice %1 {offsets = [0, 0, 0], sizes = [16, 16, 4], strides = [1, 1, 1]} : vector<18x16x4xbf16> to vector<16x16x4xbf16>
    %3 = vector.shape_cast %2 : vector<16x16x4xbf16> to vector<256x4xbf16>
    %c0_3 = arith.constant 0 : index
    %c0_4 = arith.constant 0 : index
    %c0_5 = arith.constant 0 : index
    %c0_6 = arith.constant 0 : index
    %4 = vector.load %arg2[%c0_3, %c0_4, %c0_5, %c0_6] : memref<3x3x4x128xbf16, #tpu.memory_space<vmem>>, vector<1x1x4x128xbf16>
    %5 = vector.shape_cast %4 : vector<1x1x4x128xbf16> to vector<4x128xbf16>
    %cst = arith.constant dense<0.000000e+00> : vector<256x128xf32>
    %6 = tpu.matmul %3, %5, %cst {dimension_numbers = #tpu.dot_dimension_numbers<[1], [0], [0], [1], [0, 0, 1, 1], [], []>} : vector<256x4xbf16>, vector<4x128xbf16>, vector<256x128xf32> -> vector<256x128xf32>
    %7 = vector.extract_strided_slice %1 {offsets = [1, 0, 0], sizes = [16, 16, 4], strides = [1, 1, 1]} : vector<18x16x4xbf16> to vector<16x16x4xbf16>
    %8 = vector.shape_cast %7 : vector<16x16x4xbf16> to vector<256x4xbf16>
    %c1 = arith.constant 1 : index
    %c0_7 = arith.constant 0 : index
    %c0_8 = arith.constant 0 : index
    %c0_9 = arith.constant 0 : index
    %9 = vector.load %arg2[%c1, %c0_7, %c0_8, %c0_9] : memref<3x3x4x128xbf16, #tpu.memory_space<vmem>>, vector<1x1x4x128xbf16>
    %10 = vector.shape_cast %9 : vector<1x1x4x128xbf16> to vector<4x128xbf16>
    %cst_10 = arith.constant dense<0.000000e+00> : vector<256x128xf32>
    %11 = tpu.matmul %8, %10, %cst_10 {dimension_numbers = #tpu.dot_dimension_numbers<[1], [0], [0], [1], [0, 0, 1, 1], [], []>} : vector<256x4xbf16>, vector<4x128xbf16>, vector<256x128xf32> -> vector<256x128xf32>
    %12 = arith.addf %6, %11 : vector<256x128xf32>
    %13 = vector.extract_strided_slice %1 {offsets = [2, 0, 0], sizes = [16, 16, 4], strides = [1, 1, 1]} : vector<18x16x4xbf16> to vector<16x16x4xbf16>
    %14 = vector.shape_cast %13 : vector<16x16x4xbf16> to vector<256x4xbf16>
    %c2 = arith.constant 2 : index
    %c0_11 = arith.constant 0 : index
    %c0_12 = arith.constant 0 : index
    %c0_13 = arith.constant 0 : index
    %15 = vector.load %arg2[%c2, %c0_11, %c0_12, %c0_13] : memref<3x3x4x128xbf16, #tpu.memory_space<vmem>>, vector<1x1x4x128xbf16>
    %16 = vector.shape_cast %15 : vector<1x1x4x128xbf16> to vector<4x128xbf16>
    %cst_14 = arith.constant dense<0.000000e+00> : vector<256x128xf32>
    %17 = tpu.matmul %14, %16, %cst_14 {dimension_numbers = #tpu.dot_dimension_numbers<[1], [0], [0], [1], [0, 0, 1, 1], [], []>} : vector<256x4xbf16>, vector<4x128xbf16>, vector<256x128xf32> -> vector<256x128xf32>
    %18 = arith.addf %12, %17 : vector<256x128xf32>
    %c0_15 = arith.constant 0 : index
    %c0_16 = arith.constant 0 : index
    %c1_17 = arith.constant 1 : index
    %c0_18 = arith.constant 0 : index
    %19 = vector.load %arg1[%c0_15, %c0_16, %c1_17, %c0_18] : memref<1x18x18x4xbf16, #tpu.memory_space<vmem>>, vector<1x18x16x4xbf16>
    %20 = vector.shape_cast %19 : vector<1x18x16x4xbf16> to vector<18x16x4xbf16>
    %21 = vector.extract_strided_slice %20 {offsets = [0, 0, 0], sizes = [16, 16, 4], strides = [1, 1, 1]} : vector<18x16x4xbf16> to vector<16x16x4xbf16>
    %22 = vector.shape_cast %21 : vector<16x16x4xbf16> to vector<256x4xbf16>
    %c0_19 = arith.constant 0 : index
    %c1_20 = arith.constant 1 : index
    %c0_21 = arith.constant 0 : index
    %c0_22 = arith.constant 0 : index
    %23 = vector.load %arg2[%c0_19, %c1_20, %c0_21, %c0_22] : memref<3x3x4x128xbf16, #tpu.memory_space<vmem>>, vector<1x1x4x128xbf16>
    %24 = vector.shape_cast %23 : vector<1x1x4x128xbf16> to vector<4x128xbf16>
    %cst_23 = arith.constant dense<0.000000e+00> : vector<256x128xf32>
    %25 = tpu.matmul %22, %24, %cst_23 {dimension_numbers = #tpu.dot_dimension_numbers<[1], [0], [0], [1], [0, 0, 1, 1], [], []>} : vector<256x4xbf16>, vector<4x128xbf16>, vector<256x128xf32> -> vector<256x128xf32>
    %26 = arith.addf %18, %25 : vector<256x128xf32>
    %27 = vector.extract_strided_slice %20 {offsets = [1, 0, 0], sizes = [16, 16, 4], strides = [1, 1, 1]} : vector<18x16x4xbf16> to vector<16x16x4xbf16>
    %28 = vector.shape_cast %27 : vector<16x16x4xbf16> to vector<256x4xbf16>
    %c1_24 = arith.constant 1 : index
    %c1_25 = arith.constant 1 : index
    %c0_26 = arith.constant 0 : index
    %c0_27 = arith.constant 0 : index
    %29 = vector.load %arg2[%c1_24, %c1_25, %c0_26, %c0_27] : memref<3x3x4x128xbf16, #tpu.memory_space<vmem>>, vector<1x1x4x128xbf16>
    %30 = vector.shape_cast %29 : vector<1x1x4x128xbf16> to vector<4x128xbf16>
    %cst_28 = arith.constant dense<0.000000e+00> : vector<256x128xf32>
    %31 = tpu.matmul %28, %30, %cst_28 {dimension_numbers = #tpu.dot_dimension_numbers<[1], [0], [0], [1], [0, 0, 1, 1], [], []>} : vector<256x4xbf16>, vector<4x128xbf16>, vector<256x128xf32> -> vector<256x128xf32>
    %32 = arith.addf %26, %31 : vector<256x128xf32>
    %33 = vector.extract_strided_slice %20 {offsets = [2, 0, 0], sizes = [16, 16, 4], strides = [1, 1, 1]} : vector<18x16x4xbf16> to vector<16x16x4xbf16>
    %34 = vector.shape_cast %33 : vector<16x16x4xbf16> to vector<256x4xbf16>
    %c2_29 = arith.constant 2 : index
    %c1_30 = arith.constant 1 : index
    %c0_31 = arith.constant 0 : index
    %c0_32 = arith.constant 0 : index
    %35 = vector.load %arg2[%c2_29, %c1_30, %c0_31, %c0_32] : memref<3x3x4x128xbf16, #tpu.memory_space<vmem>>, vector<1x1x4x128xbf16>
    %36 = vector.shape_cast %35 : vector<1x1x4x128xbf16> to vector<4x128xbf16>
    %cst_33 = arith.constant dense<0.000000e+00> : vector<256x128xf32>
    %37 = tpu.matmul %34, %36, %cst_33 {dimension_numbers = #tpu.dot_dimension_numbers<[1], [0], [0], [1], [0, 0, 1, 1], [], []>} : vector<256x4xbf16>, vector<4x128xbf16>, vector<256x128xf32> -> vector<256x128xf32>
    %38 = arith.addf %32, %37 : vector<256x128xf32>
    %c0_34 = arith.constant 0 : index
    %c0_35 = arith.constant 0 : index
    %c2_36 = arith.constant 2 : index
    %c0_37 = arith.constant 0 : index
    %39 = vector.load %arg1[%c0_34, %c0_35, %c2_36, %c0_37] : memref<1x18x18x4xbf16, #tpu.memory_space<vmem>>, vector<1x18x16x4xbf16>
    %40 = vector.shape_cast %39 : vector<1x18x16x4xbf16> to vector<18x16x4xbf16>
    %41 = vector.extract_strided_slice %40 {offsets = [0, 0, 0], sizes = [16, 16, 4], strides = [1, 1, 1]} : vector<18x16x4xbf16> to vector<16x16x4xbf16>
    %42 = vector.shape_cast %41 : vector<16x16x4xbf16> to vector<256x4xbf16>
    %c0_38 = arith.constant 0 : index
    %c2_39 = arith.constant 2 : index
    %c0_40 = arith.constant 0 : index
    %c0_41 = arith.constant 0 : index
    %43 = vector.load %arg2[%c0_38, %c2_39, %c0_40, %c0_41] : memref<3x3x4x128xbf16, #tpu.memory_space<vmem>>, vector<1x1x4x128xbf16>
    %44 = vector.shape_cast %43 : vector<1x1x4x128xbf16> to vector<4x128xbf16>
    %cst_42 = arith.constant dense<0.000000e+00> : vector<256x128xf32>
    %45 = tpu.matmul %42, %44, %cst_42 {dimension_numbers = #tpu.dot_dimension_numbers<[1], [0], [0], [1], [0, 0, 1, 1], [], []>} : vector<256x4xbf16>, vector<4x128xbf16>, vector<256x128xf32> -> vector<256x128xf32>
    %46 = arith.addf %38, %45 : vector<256x128xf32>
    %47 = vector.extract_strided_slice %40 {offsets = [1, 0, 0], sizes = [16, 16, 4], strides = [1, 1, 1]} : vector<18x16x4xbf16> to vector<16x16x4xbf16>
    %48 = vector.shape_cast %47 : vector<16x16x4xbf16> to vector<256x4xbf16>
    %c1_43 = arith.constant 1 : index
    %c2_44 = arith.constant 2 : index
    %c0_45 = arith.constant 0 : index
    %c0_46 = arith.constant 0 : index
    %49 = vector.load %arg2[%c1_43, %c2_44, %c0_45, %c0_46] : memref<3x3x4x128xbf16, #tpu.memory_space<vmem>>, vector<1x1x4x128xbf16>
    %50 = vector.shape_cast %49 : vector<1x1x4x128xbf16> to vector<4x128xbf16>
    %cst_47 = arith.constant dense<0.000000e+00> : vector<256x128xf32>
    %51 = tpu.matmul %48, %50, %cst_47 {dimension_numbers = #tpu.dot_dimension_numbers<[1], [0], [0], [1], [0, 0, 1, 1], [], []>} : vector<256x4xbf16>, vector<4x128xbf16>, vector<256x128xf32> -> vector<256x128xf32>
    %52 = arith.addf %46, %51 : vector<256x128xf32>
    %53 = vector.extract_strided_slice %40 {offsets = [2, 0, 0], sizes = [16, 16, 4], strides = [1, 1, 1]} : vector<18x16x4xbf16> to vector<16x16x4xbf16>
    %54 = vector.shape_cast %53 : vector<16x16x4xbf16> to vector<256x4xbf16>
    %c2_48 = arith.constant 2 : index
    %c2_49 = arith.constant 2 : index
    %c0_50 = arith.constant 0 : index
    %c0_51 = arith.constant 0 : index
    %55 = vector.load %arg2[%c2_48, %c2_49, %c0_50, %c0_51] : memref<3x3x4x128xbf16, #tpu.memory_space<vmem>>, vector<1x1x4x128xbf16>
    %56 = vector.shape_cast %55 : vector<1x1x4x128xbf16> to vector<4x128xbf16>
    %cst_52 = arith.constant dense<0.000000e+00> : vector<256x128xf32>
    %57 = tpu.matmul %54, %56, %cst_52 {dimension_numbers = #tpu.dot_dimension_numbers<[1], [0], [0], [1], [0, 0, 1, 1], [], []>} : vector<256x4xbf16>, vector<4x128xbf16>, vector<256x128xf32> -> vector<256x128xf32>
    %58 = arith.addf %52, %57 : vector<256x128xf32>
    %59 = arith.truncf %58 : vector<256x128xf32> to vector<256x128xbf16>
    %c0_53 = arith.constant 0 : index
    %c0_54 = arith.constant 0 : index
    %c0_55 = arith.constant 0 : index
    %60 = vector.load %arg3[%c0_53, %c0_54, %c0_55] : memref<1x256x128xbf16, #tpu.memory_space<vmem>>, vector<1x256x128xbf16>
    %61 = vector.shape_cast %60 : vector<1x256x128xbf16> to vector<256x128xbf16>
    %62 = vector.shape_cast %59 : vector<256x128xbf16> to vector<1x256x128xbf16>
    tpu.vector_store %arg3[%c0_53, %c0_54, %c0_55], %62 {strides = array<i32>} : memref<1x256x128xbf16, #tpu.memory_space<vmem>>, vector<1x256x128xbf16>,
    %cst_56 = arith.constant dense<0.000000e+00> : vector<128xf32>
    %63 = vector.multi_reduction <add>, %58, %cst_56 [0] : vector<256x128xf32> to vector<128xf32>
    %64 = vector.shape_cast %63 : vector<128xf32> to vector<1x128xf32>
    %c0_57 = arith.constant 0 : index
    %c0_58 = arith.constant 0 : index
    %c0_59 = arith.constant 0 : index
    %65 = vector.load %arg4[%c0_57, %c0_58, %c0_59] : memref<1x1x128xf32, #tpu.memory_space<vmem>>, vector<1x1x128xf32>
    %66 = vector.shape_cast %65 : vector<1x1x128xf32> to vector<1x128xf32>
    %67 = vector.shape_cast %64 : vector<1x128xf32> to vector<1x1x128xf32>
    tpu.vector_store %arg4[%c0_57, %c0_58, %c0_59], %67 {strides = array<i32>} : memref<1x1x128xf32, #tpu.memory_space<vmem>>, vector<1x1x128xf32>,
    %68 = arith.mulf %58, %58 : vector<256x128xf32>
    %cst_60 = arith.constant dense<0.000000e+00> : vector<128xf32>
    %69 = vector.multi_reduction <add>, %68, %cst_60 [0] : vector<256x128xf32> to vector<128xf32>
    %70 = vector.shape_cast %69 : vector<128xf32> to vector<1x128xf32>
    %c0_61 = arith.constant 0 : index
    %c0_62 = arith.constant 0 : index
    %c0_63 = arith.constant 0 : index
    %71 = vector.load %arg5[%c0_61, %c0_62, %c0_63] : memref<1x1x128xf32, #tpu.memory_space<vmem>>, vector<1x1x128xf32>
    %72 = vector.shape_cast %71 : vector<1x1x128xf32> to vector<1x128xf32>
    %73 = vector.shape_cast %70 : vector<1x128xf32> to vector<1x1x128xf32>
    tpu.vector_store %arg5[%c0_61, %c0_62, %c0_63], %73 {strides = array<i32>} : memref<1x1x128xf32, #tpu.memory_space<vmem>>, vector<1x1x128xf32>,
    return
  }
  func.func @transform_0(%arg0: i32) -> (i32, i32, i32, i32) {
    %c0_i32 = arith.constant 0 : i32
    %c0_i32_0 = arith.constant 0 : i32
    %c0_i32_1 = arith.constant 0 : i32
    %c0_i32_2 = arith.constant 0 : i32
    return %arg0, %c0_i32, %c0_i32_0, %c0_i32_1 : i32, i32, i32, i32
  }
  func.func @transform_1(%arg0: i32) -> (i32, i32, i32, i32) {
    %c0_i32 = arith.constant 0 : i32
    %c0_i32_0 = arith.constant 0 : i32
    %c0_i32_1 = arith.constant 0 : i32
    %c0_i32_2 = arith.constant 0 : i32
    %c0_i32_3 = arith.constant 0 : i32
    return %c0_i32, %c0_i32_0, %c0_i32_1, %c0_i32_2 : i32, i32, i32, i32
  }
  func.func @transform_2(%arg0: i32) -> (i32, i32, i32) {
    %c0_i32 = arith.constant 0 : i32
    %c0_i32_0 = arith.constant 0 : i32
    %c0_i32_1 = arith.constant 0 : i32
    return %arg0, %c0_i32, %c0_i32_0 : i32, i32, i32
  }
  func.func @transform_3(%arg0: i32) -> (i32, i32, i32) {
    %c0_i32 = arith.constant 0 : i32
    %c0_i32_0 = arith.constant 0 : i32
    %c0_i32_1 = arith.constant 0 : i32
    return %arg0, %c0_i32, %c0_i32_0 : i32, i32, i32
  }
  func.func @transform_4(%arg0: i32) -> (i32, i32, i32) {
    %c0_i32 = arith.constant 0 : i32
    %c0_i32_0 = arith.constant 0 : i32
    %c0_i32_1 = arith.constant 0 : i32
    return %arg0, %c0_i32, %c0_i32_0 : i32, i32, i32
  }
}

</mosaic_0001>

<bundles_post_ra>
// kernel: tpu_custom_call.1
= control target key start
LH: loop header
LB: loop body
LE: loop exit
PB: predicated region body
PF: predicated region fallthrough
CT: control target
= control target key end

     0   :  { %10 = vsyncpa [#allocation3], 0  ;;  %s4365_s0 = inlined_call_operand.vmem [shape: bf16[2,18,18,4], index: 0, kind: input, shape index: {}]   ;;  %s4366_s1 = inlined_call_operand.vmem [shape: bf16[3,3,4,128], index: 1, kind: input, shape index: {}]   ;;  %s4367_s2 = inlined_call_operand.hbm [shape: bf16[2,256,128], index: 2, kind: output, shape index: {0}]   ;;  %s4368_s3 = inlined_call_operand.hbm [shape: f32[2,1,128], index: 3, kind: output, shape index: {1}]   ;;  %s4369_s4 = inlined_call_operand.hbm [shape: f32[2,1,128], index: 4, kind: output, shape index: {2}]  }
   0x1   :  { %12 = vsyncpa [#allocation3 + $0x1], 0 }
   0x2   :  { %13 = vsyncpa [#allocation5], 0 }
   0x3   :  { %15 = vsyncpa [#allocation5 + $0x1], 0  ;;  %s3316_s15 = smov 0   ;;  %s3318_s16 = smov 0  }
   0x4   :  { %s3320_s17 = smov 0   ;;  %s3322_s18 = smov 0  }
   0x5 LB: > { %s3337_s19 = sadd.s32 4294967295, %s3287_s18   ;;  %s2707_s20 = sadd.s32 4294967294, %s3287_s18   ;;  %s3287_s18 = sphi %s3322_s18, %s4420_s18   ;;  %s3283_s17 = sphi %s3320_s17, %s4419_s17   ;;  %s3279_s16 = sphi %s3318_s16, %s4418_s16   ;;  %s3275_s15 = sphi %s3316_s15, %s4417_s15  }
   0x6   : > { %s3341_s21 = sadd.s32 1, %s3287_s18   ;;  %s75_s22 = sadd.s32 1, %s3283_s17 }
   0x7   : > { %s72_s23 = ssub.s32 %s3287_s18, %s3341_s21  ;;  %p85_p0 = scmp.ne.s32.totalorder %s3283_s17, %s3279_s16 }
   0x8   : > { %p73_p1 = scmp.eq.s32.totalorder %s72_s23, 0  ;;  %p86_p2 = scmp.eq.s32.totalorder %s3337_s19, 1 }
   0x9   : > { %p91_p3 = scmp.ne.s32.totalorder %s3279_s16, %s3275_s15  ;;  %p92_p4 = scmp.eq.s32.totalorder %s2707_s20, 1 }
   0xa   : > { %s3354_s24 = scalar_select %p73_p1, %s3283_s17, %s75_s22  }
   0xb   : > { %p3356_p5 = por %p86_p2, %p85_p0  ;;  %p3360_p6 = por %p92_p4, %p91_p3 }
   0xc   : > { %p2710_p7 = scmp.ge.s32.totalorder %s3287_s18, 1  ;;  %p173_p8 = scmp.lt.s32.totalorder %s3287_s18, 3 }
   0xe   : > { %p174_p9 = pnand %p2710_p7, %p173_p8 }
  0x10   : > { %177 = sbr.rel (%p174_p9) target bundleno = 770 (0x302), region = 28 }
  0x15   : > { %v2713_v0 = vld [vmem:[%s4366_s1 + $0x6] sm:$0x3]  ;;  %vm381_vm0 = vcmask 1041408   ;;  %p207_p10 = scmp.lt.s32.totalorder %s3337_s19, 1  ;;  %v2814_v2 = vld [vmem:[%s4366_s1 + $0xc] sm:$0x3] }
  0x16   : > { %v383_v1 = vsel %vm381_vm0, %v2713_v0, 0  ;;  %v2835_v3 = vld [vmem:[%s4366_s1 + $0x2] sm:$0x3]  ;;  %v585_v4 = vsel %vm381_vm0, %v2814_v2, 0  ;;  %v249_v6 = vld [vmem:[%s4366_s1] sm:$0x3] }
  0x17   : > { %3074 = vmatpush.bf16.msra.mxu1 %v383_v1  ;;  %3075 = vmatpush.bf16.msra.mxu2 %v383_v1  ;;  %s208_s7 = scalar_select %p207_p10, %s3337_s19, 1  ;;  %v1248_v5 = vsel %vm381_vm0, %v2835_v3, 0  ;;  %v483_v7 = vsel %vm381_vm0, %v249_v6, 0  ;;  %v2852_v8 = vld [vmem:[%s4366_s1 + $0x8] sm:$0x3]  ;;  %vm332_vm1 = vcmask 31744  }
  0x18   : > { %3076 = vmatpush.bf16.msra.mxu3 %v383_v1  ;;  %392 = vmatpush.bf16.msra.mxu0 %v383_v1  ;;  %v1404_v9 = vsel %vm381_vm0, %v2852_v8, 0  ;;  %v2902_v27 = vld [vmem:[%s4366_s1 + $0x4] sm:$0x3]  ;;  %v2920_v31 = vld [vmem:[%s4366_s1 + $0xa] sm:$0x3]  ;;  %vm1749_vm5 = vcmask 1042432  }
  0x19   : > { %s3077_s12 = smul.u32 216, %s208_s7  ;;  %v1963_v30 = vsel %vm381_vm0, %v2902_v27, 0  ;;  %v2869_v32 = vld [vmem:[%s4366_s1 + $0xe] sm:$0x3]  ;;  %v2105_v36 = vsel %vm381_vm0, %v2920_v31, 0  ;;  %vm1750_vm6 = vcmask 1046532  }
  0x1a   : > { %v2938_v37 = vld [vmem:[%s4366_s1 + $0x10] sm:$0x3]  ;;  %v1560_v40 = vsel %vm381_vm0, %v2869_v32, 0  ;;  %vm762_vm2 = vsmask.f32 3328  ;;  %vm3500_vm7 = vmor %vm1749_vm5, %vm1750_vm6  ;;  %s4116_s8 = sand.u32 1, %s3279_s16  }
  0x1b   : > { %594 = vmatpush.bf16.msrb.mxu2 %v585_v4  ;;  %492 = vmatpush.bf16.msrb.mxu1 %v483_v7  ;;  %s3391_s22 = scalar_lea.vmem %s4365_s0, %s3077_s12  ;;  %v2247_v41 = vsel %vm381_vm0, %v2938_v37, 0  ;;  %vm763_vm3 = vsmask.f32 7440  ;;  %s2711_s9 = sshll.u32 %s4116_s8, 7 }
  0x1c   : > { %1257 = vmatpush.bf16.msrb.mxu3 %v1248_v5  ;;  %1413 = vmatpush.bf16.msrb.mxu0 %v1404_v9  ;;  %v3394_v10 = vld [vmem:[%s3391_s22 + $0x3c] sm:$0xff]  ;;  %v3397_v11 = vld [vmem:[%s3391_s22 + $0x6c] sm:$0xff]  ;;  %v3431_v18 = vld [vmem:[%s3391_s22 + $0x54] sm:$0xff]  ;;  %s4133_s10 = scalar_lea.vmem [#allocation2], %s2711_s9  ;;  %s2978_s11 = sshll.u32 %s3337_s19, 7 }
  0x1d   : > { %v3400_v12 = vld [vmem:[%s3391_s22 + $0x9c] sm:$0xff]  ;;  %v3403_v13 = vld [vmem:[%s3391_s22 + $0xc] sm:$0xff]  ;;  %2782 = vmatmul.msk.bf16.vlgmr.msra.gmra.mxu1 %vm332_vm1, %v3394_v10  ;;  %2786 = vmatmul.msk.bf16.vlgmr.msra.gmra.mxu2 %vm332_vm1, %v3397_v11  ;;  %v3434_v19 = vld [vmem:[%s3391_s22 + $0x84] sm:$0xff]  ;;  %s2562_s14 = scalar_lea.hbm %s4367_s2, %s2978_s11  ;;  %s2543_s27 = scalar_lea.sflag [#allocation3], %s4116_s8 }
  0x1e   : > { %2790 = vmatmul.msk.bf16.vlgmr.msra.gmra.mxu3 %vm332_vm1, %v3400_v12  ;;  %2778 = vmatmul.msk.bf16.vlgmr.msra.gmra.mxu0 %vm332_vm1, %v3403_v13  ;;  %v3414_v14 = vld [vmem:[%s3391_s22 + $0x48] sm:$0xff]  ;;  %v3417_v15 = vld [vmem:[%s3391_s22 + $0x78] sm:$0xff]  ;;  %v708_v22 = vld [vmem:[%s3391_s22] sm:$0xf]  ;;  %s2565_s23 = sshll.u32 %s2562_s14, 4  ;;  %s3185_s6 = scalar_lea.hbm %s4367_s2, 256  ;;  %s2566_s23 = int_to_ptr.hbm [resolvable:$true] %s2565_s23 }
  0x1f   : > { %v2974_v16 = vld [vmem:[%s3391_s22 + $0xa8] sm:$0xff]  ;;  %v3421_v17 = vld [vmem:[%s3391_s22 + $0x18] sm:$0xff]  ;;  %v709_v23 = vld [vmem:[%s3391_s22 + $0x4] sm:$0xf]  ;;  %v766_v25 = vshrl.u32 %v708_v22, 16  ;;  %v769_v26 = vshll.u32 %v708_v22, 16  ;;  %1972 = vmatpush.bf16.msra.mxu2 %v1963_v30  ;;  %1569 = vmatpush.bf16.msra.mxu1 %v1560_v40 }
  0x20   : > { %v2975_v20 = vld [vmem:[%s3391_s22 + $0xb4] sm:$0xff]  ;;  %v3438_v21 = vld [vmem:[%s3391_s22 + $0x24] sm:$0xff]  ;;  %v711_v24 = vld [vmem:[%s3391_s22 + $0xc] sm:$0xf]  ;;  %v775_v29 = vshll.u32 %v709_v23, 16  ;;  %v779_v33 = vshrl.u32 %v709_v23, 16  ;;  %2114 = vmatpush.bf16.msra.mxu3 %v2105_v36  ;;  %2256 = vmatpush.bf16.msra.mxu0 %v2247_v41 }
  0x21   : > { %v712_v28 = vld [vmem:[%s3391_s22 + $0x10] sm:$0xf]  ;;  %v790_v34 = vshrl.u32 %v711_v24, 16  ;;  %v793_v35 = vshll.u32 %v711_v24, 16  ;;  %v768_v42 = vrot.slane %v766_v25, 4  ;;  %v771_v43 = vrot.slane %v769_v26, 5  ;;  %vm3489_vm4 = vmor %vm762_vm2, %vm763_vm3 }
  0x22   : > { %v799_v38 = vshll.u32 %v712_v28, 16  ;;  %v803_v39 = vshrl.u32 %v712_v28, 16  ;;  %v777_v44 = vrot.slane %v775_v29, 5  ;;  %v781_v45 = vrot.slane %v779_v33, 4  ;;  %v710_v50 = vld [vmem:[%s3391_s22 + $0x8] sm:$0x1] }
  0x23   : > { %v792_v46 = vrot.slane %v790_v34, 4  ;;  %v795_v47 = vrot.slane %v793_v35, 5  ;;  %v713_v51 = vld [vmem:[%s3391_s22 + $0x14] sm:$0x1]  ;;  %v772_v52 = vor.u32 %v771_v43, %v768_v42  ;;  %v3470_v53 = vld [vmem:[%s3391_s22 + $0x60] sm:$0xff]  ;;  %v785_v56 = vshll.u32 %v710_v50, 16 }
  0x24   : > { %v801_v48 = vrot.slane %v799_v38, 5  ;;  %v805_v49 = vrot.slane %v803_v39, 4  ;;  %v3473_v54 = vld [vmem:[%s3391_s22 + $0x90] sm:$0xff]  ;;  %v782_v55 = vor.u32 %v781_v45, %v777_v44  ;;  %v2976_v59 = vld [vmem:[%s3391_s22 + $0xc0] sm:$0xff]  ;;  %v809_v61 = vshll.u32 %v713_v51, 16  ;;  %s3179_s28 = sshra.s32 %s2566_s23, 4  ;;  %s3180_s28 = int_to_ptr.hbm [resolvable:$true] %s3179_s28 }
  0x25   : > { %v796_v57 = vor.u32 %v795_v47, %v792_v46  ;;  %v3477_v60 = vld [vmem:[%s3391_s22 + $0x30] sm:$0xff]  ;;  %v773_v62 = vrot.slane %v772_v52, 4  ;;  %v787_v0 = vrot.slane %v785_v56, 5  ;;  %v3484_v3 = vld [vmem:[%s3391_s22 + $0x1c] sm:$0xf]  ;;  %v2960_v39 = vld [vmem:[%s3391_s22] sm:$0xff]  ;;  %p3186_p0 = scmp.lt.s32.totalorder %s3180_s28, %s4367_s2 }
  0x26   : > { %v806_v58 = vor.u32 %v805_v49, %v801_v48  ;;  %v783_v63 = vrot.slane %v782_v55, 4  ;;  %v811_v5 = vrot.slane %v809_v61, 5  ;;  %v716_v6 = vld [vmem:[%s3391_s22 + $0x20] sm:$0x1]  ;;  %v4370_v7 = vrot.slane %v3484_v3, 5  ;;  %s3181_s29 = scalar_lea.hbm %s3180_s28, 128 }
  0x27   : > { %v797_v1 = vrot.slane %v796_v57, 4  ;;  %v1771_v8 = vrot.slane %v716_v6, 5  ;;  %v714_v9 = vld [vmem:[%s3391_s22 + $0x18] sm:$0xf]  ;;  %v823_v29 = vshll.u32 %v3484_v3, 16  ;;  %v827_v30 = vshrl.u32 %v3484_v3, 16  ;;  %p3182_p11 = scmp.ne.s32.totalorder %s3180_s28, %s3181_s29  ;;  %p3187_p1 = scmp.lt.s32.totalorder %s3185_s6, %s3181_s29 }
  0x28   : > { %v807_v2 = vrot.slane %v806_v58, 4  ;;  %v788_v23 = vsel %vm3489_vm4, %v783_v63, %v787_v0  ;;  %v814_v27 = vshrl.u32 %v714_v9, 16  ;;  %v817_v28 = vshll.u32 %v714_v9, 16  ;;  %v717_v45 = vld [vmem:[%s3391_s22 + $0x24] sm:$0xf] }
  0x29   : > { %v802_v24 = vsel %vm3489_vm4, %v797_v1, %v801_v48  ;;  %v1152_v32 = vunpack.c.l.b16 %v788_v23  ;;  %v825_v37 = vrot.slane %v823_v29, 5  ;;  %v829_v38 = vrot.slane %v827_v30, 4  ;;  %v718_v46 = vld [vmem:[%s3391_s22 + $0x28] sm:$0xf]  ;;  %v719_v1 = vld [vmem:[%s3391_s22 + $0x2c] sm:$0x1]  ;;  %p3183_p12 = pnand %p3182_p11, %p3356_p5  ;;  %p3188_p2 = por %p3187_p1, %p3186_p0 }
  0x2a   : > { %v812_v25 = vsel %vm3489_vm4, %v807_v2, %v811_v5  ;;  %v1153_v33 = vunpack.c.l.b16 %v802_v24  ;;  %v816_v35 = vrot.slane %v814_v27, 4  ;;  %v819_v36 = vrot.slane %v817_v28, 5  ;;  %v720_v23 = vld [vmem:[%s3391_s22 + $0x30] sm:$0xf]  ;;  %v721_v24 = vld [vmem:[%s3391_s22 + $0x34] sm:$0xf] }
  0x2b   : > { %v1154_v34 = vunpack.c.l.b16 %v812_v25  ;;  %v830_v43 = vor.u32 %v829_v38, %v825_v37  ;;  %v838_v50 = vshrl.u32 %v717_v45, 16  ;;  %v841_v51 = vshll.u32 %v717_v45, 16  ;;  %v723_v45 = vld [vmem:[%s3391_s22 + $0x3c] sm:$0xf]  ;;  %p3184_p13 = pneg %p3183_p12 }
  0x2c   : > { %v820_v42 = vor.u32 %v819_v36, %v816_v35  ;;  %v847_v52 = vshll.u32 %v718_v46, 16  ;;  %v851_v55 = vshrl.u32 %v718_v46, 16  ;;  %v862_v27 = vshrl.u32 %v720_v23, 16  ;;  %v724_v46 = vld [vmem:[%s3391_s22 + $0x40] sm:$0xf] }
  0x2d   : > { %2783 = vmatmul.msk.bf16.gmra.mxu1 %vm332_vm1, %v3414_v14  ;;  %2787 = vmatmul.msk.bf16.gmra.mxu2 %vm332_vm1, %v3417_v15  ;;  %v1184_v41 = vpack.c.b16 %v1154_v34, %v1153_v33  ;;  %v831_v48 = vrot.slane %v830_v43, 4  ;;  %v840_v58 = vrot.slane %v838_v50, 4  ;;  %v865_v28 = vshll.u32 %v720_v23, 16  ;;  %p3189_p3 = pnand %p3188_p2, %p3184_p13 }
  0x2e   : > { %2791 = vmatmul.msk.bf16.gmra.mxu3 %vm332_vm1, %v2974_v16  ;;  %2779 = vmatmul.msk.bf16.gmra.mxu0 %vm332_vm1, %v3421_v17  ;;  %v1770_v16 = vrot.slane %v4370_v7, 4  ;;  %v821_v47 = vrot.slane %v820_v42, 4  ;;  %v849_v61 = vrot.slane %v847_v52, 5  ;;  %v871_v29 = vshll.u32 %v721_v24, 16 }
  0x2f   : > { %v875_v30 = vshrl.u32 %v721_v24, 16  ;;  %v864_v33 = vrot.slane %v862_v27, 4  ;;  %v867_v34 = vrot.slane %v865_v28, 5  ;;  %v895_v50 = vshll.u32 %v724_v46, 16 }
  0x30   : > { %v3512_v26 = vsel %vm3500_vm7, %v1770_v16, %v1771_v8  ;;  %v826_v56 = vsel %vm3489_vm4, %v821_v47, %v825_v37  ;;  %v873_v35 = vrot.slane %v871_v29, 5  ;;  %v722_v37 = vld [vmem:[%s3391_s22 + $0x38] sm:$0x1] }
  0x31   : > { %v1155_v63 = vunpack.c.l.b16 %v826_v56  ;;  %v877_v36 = vrot.slane %v875_v30, 4 }
  0x3d   : > { %2784 = vmatmul.msk.bf16.gmra.mxu1 %vm332_vm1, %v3431_v18  ;;  %2788 = vmatmul.msk.bf16.gmra.mxu2 %vm332_vm1, %v3434_v19 }
  0x3e   : > { %2792 = vmatmul.msk.bf16.gmra.mxu3 %vm332_vm1, %v2975_v20  ;;  %2780 = vmatmul.msk.bf16.gmra.mxu0 %vm332_vm1, %v3438_v21  ;;  %v778_v20 = vsel %vm3489_vm4, %v773_v62, %v777_v44  ;;  %v833_v44 = vshll.u32 %v716_v6, 16  ;;  %v853_v62 = vrot.slane %v851_v55, 4  ;;  %v857_v6 = vshll.u32 %v719_v1, 16 }
  0x3f   : > { %v1151_v31 = vunpack.c.l.b16 %v778_v20 }
  0x40   : > { %v835_v49 = vrot.slane %v833_v44, 5  ;;  %v854_v5 = vor.u32 %v853_v62, %v849_v61  ;;  %v859_v20 = vrot.slane %v857_v6, 5 }
  0x41   : > { %v1183_v40 = vpack.c.b16 %v1152_v32, %v1151_v31 }
  0x42   : > { %v836_v57 = vsel %vm3489_vm4, %v831_v48, %v835_v49  ;;  %v855_v16 = vrot.slane %v854_v5, 4  ;;  %v886_v48 = vshrl.u32 %v723_v45, 16  ;;  %v889_v49 = vshll.u32 %v723_v45, 16  ;;  %v727_v5 = vld [vmem:[%s3391_s22 + $0x4c] sm:$0xf] }
  0x43   : > { %v1156_v0 = vunpack.c.l.b16 %v836_v57  ;;  %v919_v24 = vshll.u32 %v727_v5, 16  ;;  %v730_v45 = vld [vmem:[%s3391_s22 + $0x58] sm:$0xf] }
  0x44   : > { %v888_v56 = vrot.slane %v886_v48, 4  ;;  %v891_v57 = vrot.slane %v889_v49, 5 }
  0x45   : > { %v3529_v8 = vpack.c.b16 %v1156_v0, %v1155_v63  ;;  %v921_v29 = vrot.slane %v919_v24, 5 }
  0x46   : > { %v892_v63 = vor.u32 %v891_v57, %v888_v56 }
  0x48   : > { %v893_v6 = vrot.slane %v892_v63, 4 }
  0x4d   : > { %2785 = vmatmul.msk.bf16.gmra.mxu1 %vm332_vm1, %v3470_v53  ;;  %2789 = vmatmul.msk.bf16.gmra.mxu2 %vm332_vm1, %v3473_v54 }
  0x4e   : > { %2793 = vmatmul.msk.bf16.gmra.mxu3 %vm332_vm1, %v2976_v59  ;;  %2781 = vmatmul.msk.bf16.gmra.mxu0 %vm332_vm1, %v3477_v60  ;;  %v843_v59 = vrot.slane %v841_v51, 5  ;;  %v899_v51 = vshrl.u32 %v724_v46, 16 }
  0x50   : > { %v844_v2 = vor.u32 %v843_v59, %v840_v58  ;;  %v897_v58 = vrot.slane %v895_v50, 5  ;;  %v901_v59 = vrot.slane %v899_v51, 4  ;;  %v943_v51 = vshll.u32 %v730_v45, 16 }
  0x52   : > { %v845_v9 = vrot.slane %v844_v2, 4  ;;  %v902_v0 = vor.u32 %v901_v59, %v897_v58  ;;  %v726_v2 = vld [vmem:[%s3391_s22 + $0x48] sm:$0xf] }
  0x53   : > { %v913_v23 = vshll.u32 %v726_v2, 16 }
  0x54   : > { %v850_v25 = vsel %vm3489_vm4, %v845_v9, %v849_v61  ;;  %v725_v61 = vld [vmem:[%s3391_s22 + $0x44] sm:$0x1]  ;;  %v903_v9 = vrot.slane %v902_v0, 4  ;;  %v731_v0 = vld [vmem:[%s3391_s22 + $0x5c] sm:$0x1] }
  0x55   : > { %v1157_v31 = vunpack.c.l.b16 %v850_v25  ;;  %v905_v1 = vshll.u32 %v725_v61, 16  ;;  %v923_v25 = vshrl.u32 %v727_v5, 16  ;;  %v915_v28 = vrot.slane %v913_v23, 5 }
  0x56   : > { %v945_v61 = vrot.slane %v943_v51, 5 }
  0x57   : > { %v925_v30 = vrot.slane %v923_v25, 4 }
  0x5d   : > { %2798 = vmatmul.msk.bf16.vlgmr.msrb.gmra.mxu1 %vm332_vm1, %v2960_v39  ;;  %2819 = vmatmul.msk.bf16.vlgmr.msrb.gmra.mxu2 %vm332_vm1, %v3421_v17  ;;  %v868_v39 = vor.u32 %v867_v34, %v864_v33  ;;  %v728_v33 = vld [vmem:[%s3391_s22 + $0x50] sm:$0x1] }
  0x5e   : > { %2836 = vmatmul.msk.bf16.vlgmr.msrb.gmra.mxu3 %vm332_vm1, %v1183_v40  ;;  %2853 = vmatmul.msk.bf16.vlgmr.msrb.gmra.mxu0 %vm332_vm1, %v1184_v41  ;;  %v878_v40 = vor.u32 %v877_v36, %v873_v35  ;;  %v929_v36 = vshll.u32 %v728_v33, 16 }
  0x5f   : > { %v869_v42 = vrot.slane %v868_v39, 4 }
  0x60   : > { %v879_v43 = vrot.slane %v878_v40, 4 }
  0x61   : > { %v874_v47 = vsel %vm3489_vm4, %v869_v42, %v873_v35  ;;  %v926_v35 = vor.u32 %v925_v30, %v921_v29 }
  0x62   : > { %v1159_v52 = vunpack.c.l.b16 %v874_v47 }
  0x63   : > { %v927_v42 = vrot.slane %v926_v35, 4 }
  0x6d   : > { %2799 = vmatmul.msk.bf16.gmra.mxu1 %vm332_vm1, %v3403_v13  ;;  %2820 = vmatmul.msk.bf16.gmra.mxu2 %vm332_vm1, %v3438_v21  ;;  %v860_v13 = vsel %vm3489_vm4, %v855_v16, %v859_v20  ;;  %v907_v16 = vrot.slane %v905_v1, 5  ;;  %v910_v20 = vshrl.u32 %v726_v2, 16 }
  0x6e   : > { %2837 = vmatmul.msk.bf16.gmra.mxu3 %vm332_vm1, %v1184_v41  ;;  %2854 = vmatmul.msk.bf16.gmra.mxu0 %vm332_vm1, %v3529_v8  ;;  %v1158_v32 = vunpack.c.l.b16 %v860_v13  ;;  %v881_v41 = vshll.u32 %v722_v37, 16 }
  0x6f   : > { %v908_v13 = vsel %vm3489_vm4, %v903_v9, %v907_v16  ;;  %v912_v27 = vrot.slane %v910_v20, 4  ;;  %v953_v20 = vshll.u32 %v731_v0, 16 }
  0x70   : > { %v3545_v38 = vpack.c.b16 %v1158_v32, %v1157_v31  ;;  %v883_v44 = vrot.slane %v881_v41, 5  ;;  %v1162_v32 = vunpack.c.l.b16 %v908_v13 }
  0x71   : > { %v916_v34 = vor.u32 %v915_v28, %v912_v27  ;;  %v732_v27 = vld [vmem:[%s3391_s22 + $0x60] sm:$0xf]  ;;  %v733_v28 = vld [vmem:[%s3391_s22 + $0x64] sm:$0xf] }
  0x72   : > { %v958_v33 = vshrl.u32 %v732_v27, 16  ;;  %v967_v35 = vshll.u32 %v733_v28, 16 }
  0x73   : > { %v917_v41 = vrot.slane %v916_v34, 4  ;;  %v961_v34 = vshll.u32 %v732_v27, 16 }
  0x7d   : > { %2800 = vmatmul.msk.bf16.gmra.mxu1 %vm332_vm1, %v3421_v17  ;;  %2821 = vmatmul.msk.bf16.gmra.mxu2 %vm332_vm1, %v3477_v60  ;;  %v884_v17 = vsel %vm3489_vm4, %v879_v43, %v883_v44  ;;  %v931_v43 = vrot.slane %v929_v36, 5  ;;  %v729_v44 = vld [vmem:[%s3391_s22 + $0x54] sm:$0xf]  ;;  %v971_v36 = vshrl.u32 %v733_v28, 16 }
  0x7e   : > { %2838 = vmatmul.msk.bf16.gmra.mxu3 %vm332_vm1, %v3529_v8  ;;  %2855 = vmatmul.msk.bf16.gmra.mxu0 %vm332_vm1, %v3545_v38  ;;  %v1160_v55 = vunpack.c.l.b16 %v884_v17  ;;  %v934_v49 = vshrl.u32 %v729_v44, 16  ;;  %v937_v50 = vshll.u32 %v729_v44, 16  ;;  %v963_v44 = vrot.slane %v961_v34, 5 }
  0x7f   : > { %v932_v17 = vsel %vm3489_vm4, %v927_v42, %v931_v43  ;;  %v960_v43 = vrot.slane %v958_v33, 4 }
  0x80   : > { %v3562_v62 = vpack.c.b16 %v1160_v55, %v1159_v52  ;;  %v947_v52 = vshrl.u32 %v730_v45, 16  ;;  %v1164_v57 = vunpack.c.l.b16 %v932_v17  ;;  %v939_v59 = vrot.slane %v937_v50, 5 }
  0x81   : > { %v969_v45 = vrot.slane %v967_v35, 5 }
  0x82   : > { %v949_v63 = vrot.slane %v947_v52, 4 }
  0x84   : > { %v950_v16 = vor.u32 %v949_v63, %v945_v61  ;;  %v736_v63 = vld [vmem:[%s3391_s22 + $0x70] sm:$0xf] }
  0x85   : > { %v995_v27 = vshrl.u32 %v736_v63, 16 }
  0x86   : > { %v951_v25 = vrot.slane %v950_v16, 4 }
  0x8d   : > { %2801 = vmatmul.msk.bf16.gmra.mxu1 %vm332_vm1, %v3438_v21  ;;  %2822 = vmatmul.msk.bf16.gmra.mxu2 %vm332_vm1, %v3394_v10  ;;  %v898_v21 = vsel %vm3489_vm4, %v893_v6, %v897_v58  ;;  %v936_v58 = vrot.slane %v934_v49, 4  ;;  %v734_v49 = vld [vmem:[%s3391_s22 + $0x68] sm:$0x1] }
  0x8e   : > { %2839 = vmatmul.msk.bf16.gmra.mxu3 %vm332_vm1, %v3545_v38  ;;  %2856 = vmatmul.msk.bf16.gmra.mxu0 %vm332_vm1, %v3562_v62  ;;  %v1161_v31 = vunpack.c.l.b16 %v898_v21  ;;  %v955_v21 = vrot.slane %v953_v20, 5 }
  0x8f   : > { %v940_v9 = vor.u32 %v939_v59, %v936_v58  ;;  %v977_v59 = vshll.u32 %v734_v49, 16 }
  0x90   : > { %v3581_v39 = vpack.c.b16 %v1162_v32, %v1161_v31  ;;  %v956_v31 = vsel %vm3489_vm4, %v951_v25, %v955_v21  ;;  %v991_v21 = vshll.u32 %v736_v63, 16 }
  0x91   : > { %v941_v24 = vrot.slane %v940_v9, 4  ;;  %v1166_v42 = vunpack.c.l.b16 %v956_v31  ;;  %v979_v16 = vrot.slane %v977_v59, 5 }
  0x93   : > { %v946_v30 = vsel %vm3489_vm4, %v941_v24, %v945_v61  ;;  %v735_v61 = vld [vmem:[%s3391_s22 + $0x6c] sm:$0xf] }
  0x94   : > { %v985_v25 = vshll.u32 %v735_v61, 16 }
  0x96   : > { %v987_v35 = vrot.slane %v985_v25, 5  ;;  %v739_v25 = vld [vmem:[%s3391_s22 + $0x7c] sm:$0xf] }
  0x9a   : > { %v3579_v37 = vpop.f32.mrf.mxu1 }
  0x9b   : > { %v3583_v40 = vpop.f32.mrf.mxu0 }
  0x9d   : > { %2802 = vmatmul.msk.bf16.gmra.mxu1 %vm332_vm1, %v3477_v60  ;;  %2823 = vmatmul.msk.bf16.gmra.mxu2 %vm332_vm1, %v3414_v14  ;;  %v922_v60 = vsel %vm3489_vm4, %v917_v41, %v921_v29  ;;  %v1165_v41 = vunpack.c.l.b16 %v946_v30 }
  0x9e   : > { %2840 = vmatmul.msk.bf16.gmra.mxu3 %vm332_vm1, %v3562_v62  ;;  %2857 = vmatmul.msk.bf16.gmra.mxu0 %vm332_vm1, %v3581_v39  ;;  %v1163_v56 = vunpack.c.l.b16 %v922_v60  ;;  %v973_v60 = vrot.slane %v971_v36, 4  ;;  %v993_v36 = vrot.slane %v991_v21, 5 }
  0x9f   : > { %v3647_v52 = vpack.c.b16 %v1166_v42, %v1165_v41  ;;  %v997_v41 = vrot.slane %v995_v27, 4 }
  0xa0   : > { %v3595_v46 = vpop.f32.mrf.mxu2  ;;  %v3614_v6 = vpack.c.b16 %v1164_v57, %v1163_v56  ;;  %v964_v57 = vor.u32 %v963_v44, %v960_v43  ;;  %v974_v58 = vor.u32 %v973_v60, %v969_v45  ;;  %v737_v44 = vld [vmem:[%s3391_s22 + $0x74] sm:$0x1] }
  0xa1   : > { %v3597_v47 = vpop.f32.mrf.mxu3  ;;  %4383 = vst [vmem:[#allocation12_spill] sm:$0xff] %v3647_v52  ;;  %v1001_v59 = vshll.u32 %v737_v44, 16 }
  0xa2   : > { %v3603_v48 = vpop.f32.mrf.mxu1  ;;  %v965_v0 = vrot.slane %v964_v57, 4  ;;  %v975_v9 = vrot.slane %v974_v58, 4  ;;  %v998_v58 = vor.u32 %v997_v41, %v993_v36  ;;  %v1015_v41 = vshll.u32 %v739_v25, 16 }
  0xa3   : > { %v3605_v55 = vpop.f32.mrf.mxu0 }
  0xa4   : > { %v970_v31 = vsel %vm3489_vm4, %v965_v0, %v969_v45  ;;  %v980_v33 = vsel %vm3489_vm4, %v975_v9, %v979_v16  ;;  %v999_v9 = vrot.slane %v998_v58, 4  ;;  %v1003_v16 = vrot.slane %v1001_v59, 5 }
  0xa5   : > { %v1167_v42 = vunpack.c.l.b16 %v970_v31  ;;  %v1168_v43 = vunpack.c.l.b16 %v980_v33  ;;  %v1017_v7 = vrot.slane %v1015_v41, 5 }
  0xa6   : > { %v1004_v31 = vsel %vm3489_vm4, %v999_v9, %v1003_v16 }
  0xa8   : > { %v3608_v1 = vpop.f32.mrf.mxu2 }
  0xa9   : > { %v3610_v2 = vpop.f32.mrf.mxu3 }
  0xaa   : > { %4380 = vst [vmem:[#allocation9_spill] sm:$0xff] %v3610_v2  ;;  %v3612_v5 = vpop.f32.mrf.mxu1 }
  0xab   : > { %v3616_v23 = vpop.f32.mrf.mxu0 }
  0xad   : > { %2803 = vmatmul.msk.bf16.gmra.mxu1 %vm332_vm1, %v3394_v10  ;;  %2824 = vmatmul.msk.bf16.gmra.mxu2 %vm332_vm1, %v3431_v18 }
  0xae   : > { %2841 = vmatmul.msk.bf16.gmra.mxu3 %vm332_vm1, %v3581_v39  ;;  %2858 = vmatmul.msk.bf16.gmra.mxu0 %vm332_vm1, %v3614_v6 }
  0xb0   : > { %v3626_v13 = vpop.f32.mrf.mxu2 }
  0xb1   : > { %v3630_v29 = vpop.f32.mrf.mxu3 }
  0xb2   : > { %4381 = vst [vmem:[#allocation10_spill] sm:$0xff] %v3630_v29  ;;  %v3632_v10 = vpop.f32.mrf.mxu1 }
  0xb3   : > { %v3638_v32 = vpop.f32.mrf.mxu0 }
  0xb8   : > { %v3640_v17 = vpop.f32.mrf.mxu2 }
  0xb9   : > { %v3643_v50 = vpop.f32.mrf.mxu3 }
  0xba   : > { %4382 = vst [vmem:[#allocation11_spill] sm:$0xff] %v3643_v50  ;;  %v3645_v51 = vpop.f32.mrf.mxu1 }
  0xbb   : > { %v3649_v56 = vpop.f32.mrf.mxu0 }
  0xbd   : > { %2804 = vmatmul.msk.bf16.gmra.mxu1 %vm332_vm1, %v3414_v14  ;;  %2825 = vmatmul.msk.bf16.gmra.mxu2 %vm332_vm1, %v3470_v53  ;;  %v982_v14 = vshrl.u32 %v735_v61, 16  ;;  %v3680_v61 = vpack.c.b16 %v1168_v43, %v1167_v42  ;;  %v1019_v42 = vshrl.u32 %v739_v25, 16 }
  0xbe   : > { %2842 = vmatmul.msk.bf16.gmra.mxu3 %vm332_vm1, %v3614_v6  ;;  %2859 = vmatmul.msk.bf16.gmra.mxu0 %vm332_vm1, %v3647_v52 }
  0xbf   : > { %v984_v34 = vrot.slane %v982_v14, 4  ;;  %4386 = vst [vmem:[#allocation15_spill] sm:$0xff] %v3680_v61  ;;  %v738_v14 = vld [vmem:[%s3391_s22 + $0x78] sm:$0xf] }
  0xc0   : > { %v3661_v20 = vpop.f32.mrf.mxu2 }
  0xc1   : > { %v3663_v24 = vpop.f32.mrf.mxu3  ;;  %v988_v57 = vor.u32 %v987_v35, %v984_v34  ;;  %v1006_v34 = vshrl.u32 %v738_v14, 16  ;;  %v1009_v35 = vshll.u32 %v738_v14, 16 }
  0xc2   : > { %4384 = vst [vmem:[#allocation13_spill] sm:$0xff] %v3663_v24  ;;  %v3665_v28 = vpop.f32.mrf.mxu1 }
  0xc3   : > { %v3667_v30 = vpop.f32.mrf.mxu0  ;;  %v989_v0 = vrot.slane %v988_v57, 4  ;;  %v1170_v57 = vunpack.c.l.b16 %v1004_v31  ;;  %v1008_v58 = vrot.slane %v1006_v34, 4  ;;  %v1011_v59 = vrot.slane %v1009_v35, 5 }
  0xc5   : > { %v1012_v16 = vor.u32 %v1011_v59, %v1008_v58 }
  0xc7   : > { %v1013_v34 = vrot.slane %v1012_v16, 4 }
  0xc8   : > { %v3674_v60 = vpop.f32.mrf.mxu2 }
  0xc9   : > { %v3676_v49 = vpop.f32.mrf.mxu3 }
  0xca   : > { %4385 = vst [vmem:[#allocation14_spill] sm:$0xff] %v3676_v49  ;;  %v3678_v45 = vpop.f32.mrf.mxu1  ;;  %v740_v49 = vld [vmem:[%s3391_s22 + $0x80] sm:$0x1] }
  0xcb   : > { %v3682_v63 = vpop.f32.mrf.mxu0  ;;  %v1025_v25 = vshll.u32 %v740_v49, 16 }
  0xcd   : > { %2805 = vmatmul.msk.bf16.gmra.mxu1 %vm332_vm1, %v3431_v18  ;;  %2826 = vmatmul.msk.bf16.gmra.mxu2 %vm332_vm1, %v3397_v11  ;;  %v994_v18 = vsel %vm3489_vm4, %v989_v0, %v993_v36  ;;  %v1027_v41 = vrot.slane %v1025_v25, 5 }
  0xce   : > { %2843 = vmatmul.msk.bf16.gmra.mxu3 %vm332_vm1, %v3647_v52  ;;  %2860 = vmatmul.msk.bf16.gmra.mxu0 %vm332_vm1, %v3680_v61  ;;  %v1169_v44 = vunpack.c.l.b16 %v994_v18 }
  0xd0   : > { %v3694_v21 = vpop.f32.mrf.mxu2  ;;  %v3711_v9 = vpack.c.b16 %v1170_v57, %v1169_v44 }
  0xd1   : > { %v3696_v27 = vpop.f32.mrf.mxu3 }
  0xd2   : > { %4387 = vst [vmem:[#allocation16_spill] sm:$0xff] %v3696_v27  ;;  %v3702_v33 = vpop.f32.mrf.mxu1  ;;  %v1021_v27 = vrot.slane %v1019_v42, 4  ;;  %v742_v42 = vld [vmem:[%s3391_s22 + $0x88] sm:$0xf] }
  0xd3   : > { %v3704_v43 = vpop.f32.mrf.mxu0  ;;  %v1039_v25 = vshll.u32 %v742_v42, 16 }
  0xd4   : > { %v1022_v14 = vor.u32 %v1021_v27, %v1017_v7  ;;  %v741_v27 = vld [vmem:[%s3391_s22 + $0x84] sm:$0xf] }
  0xd5   : > { %v1030_v59 = vshrl.u32 %v741_v27, 16  ;;  %v1041_v2 = vrot.slane %v1039_v25, 5 }
  0xd6   : > { %v1023_v35 = vrot.slane %v1022_v14, 4 }
  0xd7   : > { %v1032_v29 = vrot.slane %v1030_v59, 4 }
  0xd8   : > { %v3707_v24 = vpop.f32.mrf.mxu2  ;;  %v1028_v58 = vsel %vm3489_vm4, %v1023_v35, %v1027_v41  ;;  %v743_v35 = vld [vmem:[%s3391_s22 + $0x8c] sm:$0x1] }
  0xd9   : > { %v3709_v36 = vpop.f32.mrf.mxu3 }
  0xda   : > { %4388 = vst [vmem:[#allocation17_spill] sm:$0xff] %v3709_v36  ;;  %v494_v0 = vpop.f32.mrf.mxu1 }
  0xdb   : > { %v495_v18 = vadd.f32 %v494_v0, %v3583_v40  ;;  %v1415_v31 = vpop.f32.mrf.mxu0  ;;  %v1033_v0 = vshll.u32 %v741_v27, 16 }
  0xdd   : > { %2806 = vmatmul.msk.bf16.gmra.mxu1 %vm332_vm1, %v3470_v53  ;;  %2827 = vmatmul.msk.bf16.gmra.mxu2 %vm332_vm1, %v3417_v15  ;;  %v1018_v53 = vsel %vm3489_vm4, %v1013_v34, %v1017_v7  ;;  %v1035_v52 = vrot.slane %v1033_v0, 5 }
  0xde   : > { %2844 = vmatmul.msk.bf16.gmra.mxu3 %vm332_vm1, %v3680_v61  ;;  %2861 = vmatmul.msk.bf16.gmra.mxu0 %vm332_vm1, %v3711_v9  ;;  %v1043_v61 = vshrl.u32 %v742_v42, 16 }
  0xe0   : > { %v596_v49 = vpop.f32.mrf.mxu2  ;;  %v1045_v7 = vrot.slane %v1043_v61, 4  ;;  %v744_v61 = vld [vmem:[%s3391_s22 + $0x90] sm:$0xf] }
  0xe1   : > { %v676_v40 = vadd.f32 %v596_v49, %v495_v18  ;;  %v1259_v44 = vpop.f32.mrf.mxu3  ;;  %v1171_v18 = vunpack.c.l.b16 %v1018_v53  ;;  %v1172_v49 = vunpack.c.l.b16 %v1028_v58  ;;  %v1049_v53 = vshll.u32 %v743_v35, 16 }
  0xe2   : > { %v496_v57 = vpop.f32.mrf.mxu1  ;;  %v1046_v42 = vor.u32 %v1045_v7, %v1041_v2 }
  0xe3   : > { %v1339_v36 = vadd.f32 %v1259_v44, %v676_v40  ;;  %v497_v16 = vadd.f32 %v496_v57, %v3605_v55  ;;  %v1417_v14 = vpop.f32.mrf.mxu0  ;;  %v3732_v44 = vpack.c.b16 %v1172_v49, %v1171_v18  ;;  %v1036_v55 = vor.u32 %v1035_v52, %v1032_v29  ;;  %v745_v29 = vld [vmem:[%s3391_s22 + $0x94] sm:$0xf] }
  0xe4   : > { %v1047_v52 = vrot.slane %v1046_v42, 4  ;;  %v1051_v59 = vrot.slane %v1049_v53, 5  ;;  %v1057_v18 = vshll.u32 %v744_v61, 16  ;;  %v1063_v49 = vshll.u32 %v745_v29, 16 }
  0xe5   : > { %v3729_v50 = vadd.f32 %v1415_v31, %v1339_v36  ;;  %v1067_v7 = vshrl.u32 %v745_v29, 16  ;;  %v746_v29 = vld [vmem:[%s3391_s22 + $0x98] sm:$0x1] }
  0xe6   : > { %v1065_v42 = vrot.slane %v1063_v49, 5 }
  0xe7   : > { %4389 = vst [vmem:[#allocation18_spill] sm:$0xff] %v3729_v50 }
  0xe8   : > { %v598_v34 = vpop.f32.mrf.mxu2 }
  0xe9   : > { %v677_v41 = vadd.f32 %v598_v34, %v497_v16  ;;  %v1261_v27 = vpop.f32.mrf.mxu3  ;;  %v1054_v16 = vshrl.u32 %v744_v61, 16 }
  0xea   : > { %v499_v40 = vpop.f32.mrf.mxu1 }
  0xeb   : > { %v1340_v57 = vadd.f32 %v1261_v27, %v677_v41  ;;  %v500_v36 = vadd.f32 %v499_v40, %v3616_v23  ;;  %v1420_v31 = vpop.f32.mrf.mxu0  ;;  %v1037_v23 = vrot.slane %v1036_v55, 4  ;;  %v1052_v40 = vsel %vm3489_vm4, %v1047_v52, %v1051_v59 }
  0xec   : > { %v1056_v55 = vrot.slane %v1054_v16, 4 }
  0xed   : > { %2807 = vmatmul.msk.bf16.gmra.mxu1 %vm332_vm1, %v3397_v11  ;;  %2828 = vmatmul.msk.bf16.gmra.mxu2 %vm332_vm1, %v3434_v19  ;;  %v3740_v58 = vadd.f32 %v1417_v14, %v1340_v57  ;;  %v1042_v27 = vsel %vm3489_vm4, %v1037_v23, %v1041_v2  ;;  %v1059_v57 = vrot.slane %v1057_v18, 5  ;;  %v1073_v2 = vshll.u32 %v746_v29, 16 }
  0xee   : > { %2845 = vmatmul.msk.bf16.gmra.mxu3 %vm332_vm1, %v3711_v9  ;;  %2862 = vmatmul.msk.bf16.gmra.mxu0 %vm332_vm1, %v3732_v44  ;;  %v1173_v61 = vunpack.c.l.b16 %v1042_v27 }
  0xef   : > { %4390 = vst [vmem:[#allocation19_spill] sm:$0xff] %v3740_v58  ;;  %v1075_v18 = vrot.slane %v1073_v2, 5 }
  0xf0   : > { %v601_v0 = vpop.f32.mrf.mxu2 }
  0xf1   : > { %v678_v25 = vadd.f32 %v601_v0, %v500_v36  ;;  %v1264_v11 = vpop.f32.mrf.mxu3  ;;  %v1069_v36 = vrot.slane %v1067_v7, 4  ;;  %v1174_v0 = vunpack.c.l.b16 %v1052_v40  ;;  %v747_v7 = vld [vmem:[%s3391_s22 + $0x9c] sm:$0xf] }
  0xf2   : > { %v501_v14 = vpop.f32.mrf.mxu1 }
  0xf3   : > { %v1341_v34 = vadd.f32 %v1264_v11, %v678_v25  ;;  %v502_v35 = vadd.f32 %v501_v14, %v3638_v32  ;;  %v1422_v41 = vpop.f32.mrf.mxu0  ;;  %v1060_v32 = vor.u32 %v1059_v57, %v1056_v55  ;;  %v1070_v14 = vor.u32 %v1069_v36, %v1065_v42 }
  0xf4   : > { %v3755_v50 = vpack.c.b16 %v1174_v0, %v1173_v61  ;;  %v1078_v55 = vshrl.u32 %v747_v7, 16  ;;  %v1081_v57 = vshll.u32 %v747_v7, 16 }
  0xf5   : > { %v3752_v53 = vadd.f32 %v1420_v31, %v1341_v34  ;;  %v1061_v31 = vrot.slane %v1060_v32, 4 }
  0xf6   : > { %v1080_v2 = vrot.slane %v1078_v55, 4 }
  0xf8   : > { %v603_v58 = vpop.f32.mrf.mxu2 }
  0xf9   : > { %v679_v25 = vadd.f32 %v603_v58, %v502_v35  ;;  %v1266_v11 = vpop.f32.mrf.mxu3  ;;  %v1071_v58 = vrot.slane %v1070_v14, 4 }
  0xfa   : > { %v504_v23 = vpop.f32.mrf.mxu1 }
  0xfb   : > { %v1342_v52 = vadd.f32 %v1266_v11, %v679_v25  ;;  %v505_v59 = vadd.f32 %v504_v23, %v3649_v56  ;;  %v1425_v16 = vpop.f32.mrf.mxu0  ;;  %v748_v56 = vld [vmem:[%s3391_s22 + $0xa0] sm:$0xf]  ;;  %v1076_v40 = vsel %vm3489_vm4, %v1071_v58, %v1075_v18  ;;  %v1083_v23 = vrot.slane %v1081_v57, 5 }
  0xfc   : > { %v1087_v36 = vshll.u32 %v748_v56, 16  ;;  %v1091_v61 = vshrl.u32 %v748_v56, 16  ;;  %v1176_v32 = vunpack.c.l.b16 %v1076_v40 }
  0xfd   : > { %2808 = vmatmul.msk.bf16.gmra.mxu1 %vm332_vm1, %v3417_v15  ;;  %2829 = vmatmul.msk.bf16.gmra.mxu2 %vm332_vm1, %v3473_v54  ;;  %v3762_v49 = vadd.f32 %v1422_v41, %v1342_v52  ;;  %v1066_v15 = vsel %vm3489_vm4, %v1061_v31, %v1065_v42  ;;  %v1084_v56 = vor.u32 %v1083_v23, %v1080_v2 }
  0xfe   : > { %2846 = vmatmul.msk.bf16.gmra.mxu3 %vm332_vm1, %v3732_v44  ;;  %2863 = vmatmul.msk.bf16.gmra.mxu0 %vm332_vm1, %v3755_v50  ;;  %v1175_v11 = vunpack.c.l.b16 %v1066_v15  ;;  %v1089_v42 = vrot.slane %v1087_v36, 5  ;;  %v1093_v52 = vrot.slane %v1091_v61, 4  ;;  %v750_v36 = vld [vmem:[%s3391_s22 + $0xa8] sm:$0xf]  ;;  %v751_v61 = vld [vmem:[%s3391_s22 + $0xac] sm:$0xf] }
 0x100   : > { %v606_v34 = vpop.f32.mrf.mxu2  ;;  %v3778_v7 = vpack.c.b16 %v1176_v32, %v1175_v11  ;;  %v1102_v11 = vshrl.u32 %v750_v36, 16  ;;  %v1105_v32 = vshll.u32 %v750_v36, 16 }
 0x101   : > { %v680_v35 = vadd.f32 %v606_v34, %v505_v59  ;;  %v1269_v27 = vpop.f32.mrf.mxu3  ;;  %v749_v59 = vld [vmem:[%s3391_s22 + $0xa4] sm:$0x1] }
 0x102   : > { %v506_v41 = vpop.f32.mrf.mxu1 }
 0x103   : > { %v1343_v0 = vadd.f32 %v1269_v27, %v680_v35  ;;  %v507_v29 = vadd.f32 %v506_v41, %v3667_v30  ;;  %v1427_v25 = vpop.f32.mrf.mxu0  ;;  %v1094_v30 = vor.u32 %v1093_v52, %v1089_v42  ;;  %v1097_v35 = vshll.u32 %v749_v59, 16 }
 0x104   : > { %v1085_v41 = vrot.slane %v1084_v56, 4  ;;  %v1111_v59 = vshll.u32 %v751_v61, 16  ;;  %v1104_v56 = vrot.slane %v1102_v11, 4 }
 0x105   : > { %v3775_v14 = vadd.f32 %v1425_v16, %v1343_v0  ;;  %v1095_v55 = vrot.slane %v1094_v30, 4  ;;  %v1099_v57 = vrot.slane %v1097_v35, 5  ;;  %v1107_v30 = vrot.slane %v1105_v32, 5 }
 0x107   : > { %4391 = vst [vmem:[#allocation20_spill] sm:$0xff] %v3775_v14 }
 0x108   : > { %v608_v31 = vpop.f32.mrf.mxu2 }
 0x109   : > { %v681_v58 = vadd.f32 %v608_v31, %v507_v29  ;;  %v1271_v18 = vpop.f32.mrf.mxu3  ;;  %v1115_v31 = vshrl.u32 %v751_v61, 16 }
 0x10a   : > { %v509_v34 = vpop.f32.mrf.mxu1 }
 0x10b   : > { %v1344_v27 = vadd.f32 %v1271_v18, %v681_v58  ;;  %v510_v16 = vadd.f32 %v509_v34, %v3682_v63  ;;  %v1430_v15 = vpop.f32.mrf.mxu0  ;;  %v1117_v35 = vrot.slane %v1115_v31, 4 }
 0x10d   : > { %2809 = vmatmul.msk.bf16.gmra.mxu1 %vm332_vm1, %v3434_v19  ;;  %2830 = vmatmul.msk.bf16.gmra.mxu2 %vm332_vm1, %v3400_v12  ;;  %v3785_v40 = vadd.f32 %v1427_v25, %v1344_v27  ;;  %v1090_v12 = vsel %vm3489_vm4, %v1085_v41, %v1089_v42  ;;  %v1100_v25 = vsel %vm3489_vm4, %v1095_v55, %v1099_v57  ;;  %v1113_v42 = vrot.slane %v1111_v59, 5 }
 0x10e   : > { %2847 = vmatmul.msk.bf16.gmra.mxu3 %vm332_vm1, %v3755_v50  ;;  %2864 = vmatmul.msk.bf16.gmra.mxu0 %vm332_vm1, %v3778_v7  ;;  %v1177_v18 = vunpack.c.l.b16 %v1090_v12  ;;  %v1178_v34 = vunpack.c.l.b16 %v1100_v25  ;;  %v754_v25 = vld [vmem:[%s3391_s22 + $0xb8] sm:$0xf] }
 0x10f   : > { %4392 = vst [vmem:[#allocation21_spill] sm:$0xff] %v3785_v40  ;;  %v1118_v61 = vor.u32 %v1117_v35, %v1113_v42  ;;  %v1685_v40 = vld [vmem:[%s3391_s22 + $0x18] sm:$0xe] }
 0x110   : > { %v611_v63 = vpop.f32.mrf.mxu2 }
 0x111   : > { %v682_v0 = vadd.f32 %v611_v63, %v510_v16  ;;  %v1274_v29 = vpop.f32.mrf.mxu3  ;;  %v752_v16 = vld [vmem:[%s3391_s22 + $0xb0] sm:$0x1] }
 0x112   : > { %v511_v19 = vpop.f32.mrf.mxu1 }
 0x113   : > { %v1345_v2 = vadd.f32 %v1274_v29, %v682_v0  ;;  %v512_v23 = vadd.f32 %v511_v19, %v3704_v43  ;;  %v1432_v52 = vpop.f32.mrf.mxu0  ;;  %v3801_v43 = vpack.c.b16 %v1178_v34, %v1177_v18  ;;  %v1121_v0 = vshll.u32 %v752_v16, 16  ;;  %v3806_v29 = vld [vmem:[%s3391_s22 + $0xa8] sm:$0xff]  ;;  %v753_v19 = vld [vmem:[%s3391_s22 + $0xb4] sm:$0xf] }
 0x114   : > { %v1126_v59 = vshrl.u32 %v753_v19, 16  ;;  %v1129_v34 = vshll.u32 %v753_v19, 16  ;;  %v755_v19 = vld [vmem:[%s3391_s22 + $0xbc] sm:$0x1] }
 0x115   : > { %v3798_v58 = vadd.f32 %v1430_v15, %v1345_v2  ;;  %4394 = vst [vmem:[#allocation23_spill] sm:$0xff] %v3801_v43  ;;  %v1108_v15 = vor.u32 %v1107_v30, %v1104_v56  ;;  %v1119_v2 = vrot.slane %v1118_v61, 4  ;;  %v1139_v56 = vshrl.u32 %v754_v25, 16 }
 0x117   : > { %4393 = vst [vmem:[#allocation22_spill] sm:$0xff] %v3798_v58  ;;  %v1109_v32 = vrot.slane %v1108_v15, 4 }
 0x118   : > { %v613_v27 = vpop.f32.mrf.mxu2 }
 0x119   : > { %v683_v41 = vadd.f32 %v613_v27, %v512_v23  ;;  %v1276_v55 = vpop.f32.mrf.mxu3  ;;  %v1114_v16 = vsel %vm3489_vm4, %v1109_v32, %v1113_v42 }
 0x11a   : > { %v514_v57 = vpop.f32.mrf.mxu1  ;;  %v1179_v61 = vunpack.c.l.b16 %v1114_v16 }
 0x11b   : > { %v1346_v36 = vadd.f32 %v1276_v55, %v683_v41  ;;  %v1435_v63 = vpop.f32.mrf.mxu0  ;;  %v515_v11 = vadd.f32 %v514_v57, %v3579_v37  ;;  %v1128_v41 = vrot.slane %v1126_v59, 4  ;;  %v1131_v55 = vrot.slane %v1129_v34, 5  ;;  %v3130_v34 = vld [vmem:[%s3391_s22 + $0x9c] sm:$0xff] }
 0x11d   : > { %2810 = vmatmul.msk.bf16.gmra.mxu1 %vm332_vm1, %v3473_v54  ;;  %2831 = vmatmul.msk.bf16.gmra.mxu2 %vm332_vm1, %v3806_v29  ;;  %v3811_v12 = vadd.f32 %v1432_v52, %v1346_v36  ;;  %v1123_v54 = vrot.slane %v1121_v0, 5  ;;  %v1135_v52 = vshll.u32 %v754_v25, 16  ;;  %v1141_v36 = vrot.slane %v1139_v56, 4 }
 0x11e   : > { %2848 = vmatmul.msk.bf16.gmra.mxu3 %vm332_vm1, %v3778_v7  ;;  %2865 = vmatmul.msk.bf16.gmra.mxu0 %vm332_vm1, %v3801_v43  ;;  %v1132_v32 = vor.u32 %v1131_v55, %v1128_v41  ;;  %v757_v41 = vld [vmem:[%s3391_s22 + $0xc4] sm:$0xf] }
 0x11f   : > { %4395 = vst [vmem:[#allocation24_spill] sm:$0xff] %v3811_v12  ;;  %v1124_v37 = vsel %vm3489_vm4, %v1119_v2, %v1123_v54  ;;  %v1137_v57 = vrot.slane %v1135_v52, 5  ;;  %v1145_v2 = vshll.u32 %v755_v19, 16  ;;  %v3832_v52 = vld [vmem:[%s3391_s22 + $0xb4] sm:$0xff] }
 0x120   : > { %v616_v23 = vpop.f32.mrf.mxu2  ;;  %v1180_v0 = vunpack.c.l.b16 %v1124_v37 }
 0x121   : > { %v684_v31 = vadd.f32 %v616_v23, %v515_v11  ;;  %v1279_v18 = vpop.f32.mrf.mxu3 }
 0x122   : > { %v516_v30 = vpop.f32.mrf.mxu1  ;;  %v3827_v59 = vpack.c.b16 %v1180_v0, %v1179_v61  ;;  %v3132_v0 = vld [vmem:[%s3391_s22 + $0x4] sm:$0xf] }
 0x123   : > { %v1347_v35 = vadd.f32 %v1279_v18, %v684_v31  ;;  %v1437_v27 = vpop.f32.mrf.mxu0  ;;  %v517_v25 = vadd.f32 %v516_v30, %v3603_v48  ;;  %v1142_v31 = vor.u32 %v1141_v36, %v1137_v57  ;;  %v1133_v48 = vrot.slane %v1132_v32, 4 }
 0x124   : > { %v1147_v30 = vrot.slane %v1145_v2, 5  ;;  %v1754_v19 = vrot.slane %v3132_v0, 5 }
 0x125   : > { %v3823_v15 = vadd.f32 %v1435_v63, %v1347_v35  ;;  %v1143_v56 = vrot.slane %v1142_v31, 4  ;;  %v756_v35 = vld [vmem:[%s3391_s22 + $0xc0] sm:$0xf]  ;;  %v1381_v31 = vshll.u32 %v757_v41, 16 }
 0x126   : > { %v1372_v36 = vshrl.u32 %v756_v35, 16  ;;  %v1375_v61 = vshll.u32 %v756_v35, 16  ;;  %v1756_v0 = vrot.slane %v1754_v19, 4 }
 0x127   : > { %4396 = vst [vmem:[#allocation25_spill] sm:$0xff] %v3823_v15  ;;  %v1383_v12 = vrot.slane %v1381_v31, 5 }
 0x128   : > { %v618_v11 = vpop.f32.mrf.mxu2 }
 0x129   : > { %v685_v23 = vadd.f32 %v618_v11, %v517_v25  ;;  %v1281_v42 = vpop.f32.mrf.mxu3 }
 0x12a   : > { %v519_v54 = vpop.f32.mrf.mxu1 }
 0x12b   : > { %v1348_v18 = vadd.f32 %v1281_v42, %v685_v23  ;;  %v1440_v63 = vpop.f32.mrf.mxu0  ;;  %v520_v37 = vadd.f32 %v519_v54, %v3612_v5  ;;  %v1148_v23 = vsel %vm3489_vm4, %v1143_v56, %v1147_v30  ;;  %v3133_v42 = vld [vmem:[%s3391_s22 + $0x10] sm:$0xf]  ;;  %v758_v30 = vld [vmem:[%s3391_s22 + $0xc8] sm:$0x1] }
 0x12c   : > { %v1761_v32 = vrot.slane %v3133_v42, 5  ;;  %v1182_v35 = vunpack.c.l.b16 %v1148_v23 }
 0x12d   : > { %2811 = vmatmul.msk.bf16.gmra.mxu1 %vm332_vm1, %v3130_v34  ;;  %2832 = vmatmul.msk.bf16.gmra.mxu2 %vm332_vm1, %v3832_v52  ;;  %v3837_v16 = vadd.f32 %v1437_v27, %v1348_v18  ;;  %v1138_v27 = vsel %vm3489_vm4, %v1133_v48, %v1137_v57  ;;  %v1385_v18 = vshrl.u32 %v757_v41, 16  ;;  %v3134_v57 = vld [vmem:[%s3391_s22 + $0x8] sm:$0x1] }
 0x12e   : > { %2849 = vmatmul.msk.bf16.gmra.mxu3 %vm332_vm1, %v3801_v43  ;;  %2866 = vmatmul.msk.bf16.gmra.mxu0 %vm332_vm1, %v3827_v59  ;;  %v1181_v34 = vunpack.c.l.b16 %v1138_v27  ;;  %v1757_v48 = vrot.slane %v3134_v57, 5  ;;  %v1763_v42 = vrot.slane %v1761_v32, 4  ;;  %v1391_v57 = vshll.u32 %v758_v30, 16 }
 0x12f   : > { %4397 = vst [vmem:[#allocation26_spill] sm:$0xff] %v3837_v16  ;;  %v3135_v16 = vld [vmem:[%s3391_s22 + $0x14] sm:$0x1]  ;;  %v1387_v41 = vrot.slane %v1385_v18, 4 }
 0x130   : > { %v621_v55 = vpop.f32.mrf.mxu2  ;;  %v1764_v56 = vrot.slane %v3135_v16, 5  ;;  %v1758_v31 = vsel %vm3500_vm7, %v1756_v0, %v1757_v48  ;;  %v3136_v0 = vld [vmem:[%s3391_s22 + $0xc0] sm:$0xff]  ;;  %v4398_v48 = vrot.slane %v3484_v3, 5 }
 0x131   : > { %v686_v25 = vadd.f32 %v621_v55, %v520_v37  ;;  %v1284_v11 = vpop.f32.mrf.mxu3  ;;  %v1374_v37 = vrot.slane %v1372_v36, 4  ;;  %v1377_v55 = vrot.slane %v1375_v61, 5  ;;  %v3859_v61 = vpack.c.b16 %v1182_v35, %v1181_v34 }
 0x132   : > { %v521_v5 = vpop.f32.mrf.mxu1  ;;  %v1867_v18 = vunpack.c.l.b16 %v1758_v31  ;;  %v1765_v34 = vsel %vm3500_vm7, %v1763_v42, %v1764_v56 }
 0x133   : > { %v1349_v2 = vadd.f32 %v1284_v11, %v686_v25  ;;  %v1442_v54 = vpop.f32.mrf.mxu0  ;;  %v1683_v25 = vld [vmem:[%s3391_s22] sm:$0xe]  ;;  %v1684_v11 = vld [vmem:[%s3391_s22 + $0xc] sm:$0xe]  ;;  %v522_v58 = vadd.f32 %v521_v5, %v3632_v10  ;;  %v1378_v43 = vor.u32 %v1377_v55, %v1374_v37  ;;  %v1388_v55 = vor.u32 %v1387_v41, %v1383_v12 }
 0x134   : > { %v2886_v27 = vrot.slane %v1683_v25, 9  ;;  %v2887_v23 = vrot.slane %v1684_v11, 9  ;;  %v1869_v30 = vunpack.c.l.b16 %v1765_v34  ;;  %v2888_v25 = vrot.slane %v1685_v40, 9 }
 0x135   : > { %v3854_v15 = vadd.f32 %v1440_v63, %v1349_v2  ;;  %v1389_v42 = vrot.slane %v1388_v55, 4  ;;  %v1393_v41 = vrot.slane %v1391_v57, 5 }
 0x136   : > { %v1755_v63 = vsel %vm3500_vm7, %v2886_v27, %v1754_v19  ;;  %v1762_v10 = vsel %vm3500_vm7, %v2887_v23, %v1761_v32  ;;  %v1871_v19 = vunpack.c.l.b16 %v3512_v26 }
 0x137   : > { %v1866_v2 = vunpack.c.l.b16 %v1755_v63  ;;  %v1868_v35 = vunpack.c.l.b16 %v1762_v10  ;;  %v1394_v10 = vsel %vm3489_vm4, %v1389_v42, %v1393_v41 }
 0x138   : > { %v623_v36 = vpop.f32.mrf.mxu2 }
 0x139   : > { %v687_v14 = vadd.f32 %v623_v36, %v522_v58  ;;  %v1286_v16 = vpop.f32.mrf.mxu3  ;;  %v1898_v11 = vpack.c.b16 %v1867_v18, %v1866_v2  ;;  %v3875_v32 = vpack.c.b16 %v1869_v30, %v1868_v35  ;;  %v2977_v35 = vld [vmem:[%s3391_s22 + $0xcc] sm:$0xff] }
 0x13a   : > { %v524_v5 = vpop.f32.mrf.mxu1 }
 0x13b   : > { %v1350_v37 = vadd.f32 %v1286_v16, %v687_v14  ;;  %v1445_v58 = vpop.f32.mrf.mxu0  ;;  %v1769_v14 = vsel %vm3500_vm7, %v2888_v25, %v4398_v48  ;;  %v525_v40 = vadd.f32 %v524_v5, %v3645_v51 }
 0x13c   : > { %v1870_v26 = vunpack.c.l.b16 %v1769_v14 }
 0x13d   : > { %2812 = vmatmul.msk.bf16.gmra.mxu1 %vm332_vm1, %v3806_v29  ;;  %2833 = vmatmul.msk.bf16.gmra.mxu2 %vm332_vm1, %v3136_v0  ;;  %v3881_v56 = vadd.f32 %v1442_v54, %v1350_v37  ;;  %v1379_v29 = vrot.slane %v1378_v43, 4  ;;  %v1398_v43 = vunpack.c.l.b16 %v1394_v10 }
 0x13e   : > { %2850 = vmatmul.msk.bf16.gmra.mxu3 %vm332_vm1, %v3827_v59  ;;  %2867 = vmatmul.msk.bf16.gmra.mxu0 %vm332_vm1, %v3859_v61  ;;  %v3888_v3 = vpack.c.b16 %v1871_v19, %v1870_v26 }
 0x13f   : > { %v1384_v31 = vsel %vm3489_vm4, %v1379_v29, %v1383_v12 }
 0x140   : > { %v626_v27 = vpop.f32.mrf.mxu2  ;;  %v1397_v51 = vunpack.c.l.b16 %v1384_v31 }
 0x141   : > { %v688_v23 = vadd.f32 %v626_v27, %v525_v40  ;;  %v1289_v36 = vpop.f32.mrf.mxu3 }
 0x142   : > { %v526_v54 = vpop.f32.mrf.mxu1  ;;  %v3898_v55 = vpack.c.b16 %v1398_v43, %v1397_v51 }
 0x143   : > { %v1351_v16 = vadd.f32 %v1289_v36, %v688_v23  ;;  %v1447_v63 = vpop.f32.mrf.mxu0  ;;  %v527_v57 = vadd.f32 %v526_v54, %v3665_v28  ;;  %v3137_v54 = vld [vmem:[%s3391_s22 + $0x28] sm:$0xf] }
 0x145   : > { %v3894_v2 = vadd.f32 %v1445_v58, %v1351_v16  ;;  %v1686_v16 = vld [vmem:[%s3391_s22 + $0x24] sm:$0xe] }
 0x146   : > { %v2889_v51 = vrot.slane %v1686_v16, 9 }
 0x148   : > { %v628_v5 = vpop.f32.mrf.mxu2 }
 0x149   : > { %v689_v18 = vadd.f32 %v628_v5, %v527_v57  ;;  %v1291_v34 = vpop.f32.mrf.mxu3 }
 0x14a   : > { %v529_v37 = vpop.f32.mrf.mxu1 }
 0x14b   : > { %v1352_v30 = vadd.f32 %v1291_v34, %v689_v18  ;;  %v1450_v25 = vpop.f32.mrf.mxu0  ;;  %v530_v28 = vadd.f32 %v529_v37, %v3678_v45  ;;  %v1775_v45 = vrot.slane %v3137_v54, 5 }
 0x14d   : > { %2813 = vmatmul.msk.bf16.gmra.mxu1 %vm332_vm1, %v3832_v52  ;;  %2834 = vmatmul.msk.bf16.gmra.mxu2 %vm332_vm1, %v2977_v35  ;;  %v3903_v12 = vadd.f32 %v1447_v63, %v1352_v30  ;;  %v1777_v43 = vrot.slane %v1775_v45, 4  ;;  %v1776_v35 = vsel %vm3500_vm7, %v2889_v51, %v1775_v45 }
 0x14e   : > { %2851 = vmatmul.msk.bf16.gmra.mxu3 %vm332_vm1, %v3859_v61  ;;  %2868 = vmatmul.msk.bf16.gmra.mxu0 %vm332_vm1, %v3898_v55 }
 0x150   : > { %v631_v58 = vpop.f32.mrf.mxu2 }
 0x151   : > { %v690_v19 = vadd.f32 %v631_v58, %v530_v28  ;;  %v1294_v0 = vpop.f32.mrf.mxu3 }
 0x152   : > { %v531_v48 = vpop.f32.mrf.mxu1 }
 0x153   : > { %v1353_v14 = vadd.f32 %v1294_v0, %v690_v19  ;;  %v1452_v52 = vpop.f32.mrf.mxu0  ;;  %v532_v40 = vadd.f32 %v531_v48, %v3702_v33  ;;  %v3138_v33 = vld [vmem:[%s3391_s22 + $0x2c] sm:$0x1] }
 0x154   : > { %v1778_v31 = vrot.slane %v3138_v33, 5 }
 0x155   : > { %v3910_v26 = vadd.f32 %v1450_v25, %v1353_v14  ;;  %v1872_v25 = vunpack.c.l.b16 %v1776_v35 }
 0x156   : > { %v1779_v37 = vsel %vm3500_vm7, %v1777_v43, %v1778_v31 }
 0x158   : > { %v633_v29 = vpop.f32.mrf.mxu2 }
 0x159   : > { %v691_v42 = vadd.f32 %v633_v29, %v532_v40  ;;  %v1296_v41 = vpop.f32.mrf.mxu3  ;;  %v3139_v29 = vld [vmem:[%s3391_s22 + $0x34] sm:$0xf] }
 0x15a   : > { %v534_v27 = vpop.f32.mrf.mxu1 }
 0x15b   : > { %v1354_v23 = vadd.f32 %v1296_v41, %v691_v42  ;;  %v1455_v36 = vpop.f32.mrf.mxu0  ;;  %v535_v10 = vadd.f32 %v534_v27, %v3595_v46  ;;  %v1873_v46 = vunpack.c.l.b16 %v1779_v37  ;;  %v1782_v42 = vrot.slane %v3139_v29, 5  ;;  %v1687_v41 = vld [vmem:[%s3391_s22 + $0x30] sm:$0xe] }
 0x15c   : > { %v2890_v54 = vrot.slane %v1687_v41, 9 }
 0x15d   : > { %2870 = vmatmul.msk.bf16.vlgmr.msra.gmra.mxu1 %vm332_vm1, %v3529_v8  ;;  %2903 = vmatmul.msk.bf16.vlgmr.msra.gmra.mxu2 %vm332_vm1, %v1898_v11  ;;  %v3918_v63 = vadd.f32 %v1452_v52, %v1354_v23  ;;  %v3933_v14 = vpack.c.b16 %v1873_v46, %v1872_v25  ;;  %v1784_v45 = vrot.slane %v1782_v42, 4 }
 0x15e   : > { %2921 = vmatmul.msk.bf16.vlgmr.msra.gmra.mxu3 %vm332_vm1, %v3875_v32  ;;  %2939 = vmatmul.msk.bf16.vlgmr.msra.gmra.mxu0 %vm332_vm1, %v3888_v3  ;;  %v1783_v51 = vsel %vm3500_vm7, %v2890_v54, %v1782_v42 }
 0x160   : > { %v636_v57 = vpop.f32.mrf.mxu2 }
 0x161   : > { %v692_v5 = vadd.f32 %v636_v57, %v535_v10  ;;  %v1299_v18 = vpop.f32.mrf.mxu3 }
 0x162   : > { %v536_v8 = vpop.f32.mrf.mxu1 }
 0x163   : > { %v1355_v11 = vadd.f32 %v1299_v18, %v692_v5  ;;  %v1457_v34 = vpop.f32.mrf.mxu0  ;;  %v537_v28 = vadd.f32 %v536_v8, %v3608_v1  ;;  %v3140_v1 = vld [vmem:[%s3391_s22 + $0x38] sm:$0x1]  ;;  %v1874_v5 = vunpack.c.l.b16 %v1783_v51 }
 0x164   : > { %v1785_v23 = vrot.slane %v3140_v1, 5 }
 0x165   : > { %v3930_v30 = vadd.f32 %v1455_v36, %v1355_v11 }
 0x166   : > { %v1786_v43 = vsel %vm3500_vm7, %v1784_v45, %v1785_v23 }
 0x168   : > { %v638_v58 = vpop.f32.mrf.mxu2 }
 0x169   : > { %v693_v19 = vadd.f32 %v638_v58, %v537_v28  ;;  %v1301_v0 = vpop.f32.mrf.mxu3  ;;  %v3141_v28 = vld [vmem:[%s3391_s22 + $0x40] sm:$0xf] }
 0x16a   : > { %v539_v48 = vpop.f32.mrf.mxu1  ;;  %v1789_v58 = vrot.slane %v3141_v28, 5 }
 0x16b   : > { %v1356_v52 = vadd.f32 %v1301_v0, %v693_v19  ;;  %v1460_v40 = vpop.f32.mrf.mxu0  ;;  %v540_v36 = vadd.f32 %v539_v48, %v3626_v13  ;;  %v1875_v13 = vunpack.c.l.b16 %v1786_v43  ;;  %v1688_v19 = vld [vmem:[%s3391_s22 + $0x3c] sm:$0xe] }
 0x16c   : > { %v1791_v29 = vrot.slane %v1789_v58, 4 }
 0x16d   : > { %2871 = vmatmul.msk.bf16.gmra.mxu1 %vm332_vm1, %v3545_v38  ;;  %2904 = vmatmul.msk.bf16.gmra.mxu2 %vm332_vm1, %v3875_v32  ;;  %v3941_v27 = vadd.f32 %v1457_v34, %v1356_v52  ;;  %v3956_v37 = vpack.c.b16 %v1875_v13, %v1874_v5  ;;  %v3143_v13 = vld [vmem:[%s3391_s22 + $0x4c] sm:$0xf] }
 0x16e   : > { %2922 = vmatmul.msk.bf16.gmra.mxu3 %vm332_vm1, %v3888_v3  ;;  %2940 = vmatmul.msk.bf16.gmra.mxu0 %vm332_vm1, %v3933_v14 }
 0x170   : > { %v641_v16 = vpop.f32.mrf.mxu2 }
 0x171   : > { %v694_v33 = vadd.f32 %v641_v16, %v540_v36  ;;  %v1304_v38 = vpop.f32.mrf.mxu3 }
 0x172   : > { %v541_v31 = vpop.f32.mrf.mxu1 }
 0x173   : > { %v1357_v32 = vadd.f32 %v1304_v38, %v694_v33  ;;  %v1462_v10 = vpop.f32.mrf.mxu0  ;;  %v542_v18 = vadd.f32 %v541_v31, %v3640_v17  ;;  %v3142_v17 = vld [vmem:[%s3391_s22 + $0x44] sm:$0x1] }
 0x174   : > { %v1792_v48 = vrot.slane %v3142_v17, 5 }
 0x175   : > { %v3953_v57 = vadd.f32 %v1460_v40, %v1357_v32  ;;  %v2891_v40 = vrot.slane %v1688_v19, 9 }
 0x176   : > { %v1793_v54 = vsel %vm3500_vm7, %v1791_v29, %v1792_v48 }
 0x177   : > { %v1790_v36 = vsel %vm3500_vm7, %v2891_v40, %v1789_v58 }
 0x178   : > { %v643_v8 = vpop.f32.mrf.mxu2  ;;  %v1876_v16 = vunpack.c.l.b16 %v1790_v36 }
 0x179   : > { %v695_v11 = vadd.f32 %v643_v8, %v542_v18  ;;  %v1306_v34 = vpop.f32.mrf.mxu3  ;;  %v1796_v18 = vrot.slane %v3143_v13, 5  ;;  %v1689_v8 = vld [vmem:[%s3391_s22 + $0x48] sm:$0xe] }
 0x17a   : > { %v544_v35 = vpop.f32.mrf.mxu1 }
 0x17b   : > { %v1358_v25 = vadd.f32 %v1306_v34, %v695_v11  ;;  %v1465_v46 = vpop.f32.mrf.mxu0  ;;  %v545_v52 = vadd.f32 %v544_v35, %v3661_v20  ;;  %v1877_v20 = vunpack.c.l.b16 %v1793_v54 }
 0x17d   : > { %2872 = vmatmul.msk.bf16.gmra.mxu1 %vm332_vm1, %v3562_v62  ;;  %2905 = vmatmul.msk.bf16.gmra.mxu2 %vm332_vm1, %v3888_v3  ;;  %v3964_v0 = vadd.f32 %v1462_v10, %v1358_v25  ;;  %v3979_v51 = vpack.c.b16 %v1877_v20, %v1876_v16  ;;  %v2892_v25 = vrot.slane %v1689_v8, 9  ;;  %v3145_v16 = vld [vmem:[%s3391_s22 + $0x58] sm:$0xf] }
 0x17e   : > { %2923 = vmatmul.msk.bf16.gmra.mxu3 %vm332_vm1, %v3933_v14  ;;  %2941 = vmatmul.msk.bf16.gmra.mxu0 %vm332_vm1, %v3956_v37  ;;  %v1803_v20 = vrot.slane %v3145_v16, 5 }
 0x17f   : > { %v1797_v48 = vsel %vm3500_vm7, %v2892_v25, %v1796_v18 }
 0x180   : > { %v646_v42 = vpop.f32.mrf.mxu2  ;;  %v1878_v29 = vunpack.c.l.b16 %v1797_v48 }
 0x181   : > { %v696_v41 = vadd.f32 %v646_v42, %v545_v52  ;;  %v1309_v62 = vpop.f32.mrf.mxu3 }
 0x182   : > { %v546_v1 = vpop.f32.mrf.mxu1 }
 0x183   : > { %v1359_v3 = vadd.f32 %v1309_v62, %v696_v41  ;;  %v1467_v23 = vpop.f32.mrf.mxu0  ;;  %v547_v33 = vadd.f32 %v546_v1, %v3674_v60  ;;  %v3144_v60 = vld [vmem:[%s3391_s22 + $0x50] sm:$0x1] }
 0x184   : > { %v1799_v34 = vrot.slane %v3144_v60, 5 }
 0x185   : > { %v3976_v45 = vadd.f32 %v1465_v46, %v1359_v3  ;;  %v1798_v46 = vrot.slane %v1796_v18, 4 }
 0x187   : > { %v1800_v52 = vsel %vm3500_vm7, %v1798_v46, %v1799_v34  ;;  %v4399_v46 = vld [vmem:[#allocation9_spill] sm:$0xff] }
 0x188   : > { %v648_v38 = vpop.f32.mrf.mxu2 }
 0x189   : > { %v697_v31 = vadd.f32 %v648_v38, %v547_v33  ;;  %v1311_v32 = vpop.f32.mrf.mxu3  ;;  %v1690_v33 = vld [vmem:[%s3391_s22 + $0x54] sm:$0xe] }
 0x18a   : > { %v549_v10 = vpop.f32.mrf.mxu1 }
 0x18b   : > { %v1360_v43 = vadd.f32 %v1311_v32, %v697_v31  ;;  %v1470_v5 = vpop.f32.mrf.mxu0  ;;  %v550_v35 = vadd.f32 %v549_v10, %v3694_v21  ;;  %v1879_v21 = vunpack.c.l.b16 %v1800_v52  ;;  %v2893_v10 = vrot.slane %v1690_v33, 9 }
 0x18d   : > { %2873 = vmatmul.msk.bf16.gmra.mxu1 %vm332_vm1, %v3581_v39  ;;  %2906 = vmatmul.msk.bf16.gmra.mxu2 %vm332_vm1, %v3933_v14  ;;  %v3987_v11 = vadd.f32 %v1467_v23, %v1360_v43  ;;  %v4002_v23 = vpack.c.b16 %v1879_v21, %v1878_v29  ;;  %v1805_v43 = vrot.slane %v1803_v20, 4  ;;  %v1804_v60 = vsel %vm3500_vm7, %v2893_v10, %v1803_v20  ;;  %v3147_v29 = vld [vmem:[%s3391_s22 + $0x64] sm:$0xf] }
 0x18e   : > { %2924 = vmatmul.msk.bf16.gmra.mxu3 %vm332_vm1, %v3956_v37  ;;  %2942 = vmatmul.msk.bf16.gmra.mxu0 %vm332_vm1, %v3979_v51  ;;  %v1880_v25 = vunpack.c.l.b16 %v1804_v60  ;;  %v1810_v21 = vrot.slane %v3147_v29, 5  ;;  %v4404_v29 = vld [vmem:[#allocation13_spill] sm:$0xff] }
 0x190   : > { %v651_v28 = vpop.f32.mrf.mxu2  ;;  %v1812_v20 = vrot.slane %v1810_v21, 4 }
 0x191   : > { %v698_v58 = vadd.f32 %v651_v28, %v550_v35  ;;  %v1314_v39 = vpop.f32.mrf.mxu3 }
 0x192   : > { %v551_v19 = vpop.f32.mrf.mxu1 }
 0x193   : > { %v1361_v14 = vadd.f32 %v1314_v39, %v698_v58  ;;  %v1472_v17 = vpop.f32.mrf.mxu0  ;;  %v552_v42 = vadd.f32 %v551_v19, %v3707_v24  ;;  %v3146_v24 = vld [vmem:[%s3391_s22 + $0x5c] sm:$0x1] }
 0x194   : > { %v1806_v31 = vrot.slane %v3146_v24, 5 }
 0x195   : > { %v3999_v40 = vadd.f32 %v1470_v5, %v1361_v14 }
 0x196   : > { %v1807_v34 = vsel %vm3500_vm7, %v1805_v43, %v1806_v31 }
 0x198   : > { %v653_v41 = vpop.f32.mrf.mxu2 }
 0x199   : > { %v699_v62 = vadd.f32 %v653_v41, %v552_v42  ;;  %v1316_v1 = vpop.f32.mrf.mxu3  ;;  %v1691_v42 = vld [vmem:[%s3391_s22 + $0x60] sm:$0xe] }
 0x19a   : > { %v554_v3 = vpop.f32.mrf.mxu1  ;;  %v4400_v41 = vld [vmem:[#allocation12_spill] sm:$0xff]  ;;  %v2894_v16 = vrot.slane %v1691_v42, 9 }
 0x19b   : > { %v1362_v36 = vadd.f32 %v1316_v1, %v699_v62  ;;  %v1475_v54 = vpop.f32.mrf.mxu0  ;;  %v555_v32 = vadd.f32 %v554_v3, %v3597_v47  ;;  %v1881_v47 = vunpack.c.l.b16 %v1807_v34  ;;  %v3148_v1 = vld [vmem:[%s3391_s22 + $0x68] sm:$0x1] }
 0x19c   : > { %v1813_v3 = vrot.slane %v3148_v1, 5  ;;  %v1811_v43 = vsel %vm3500_vm7, %v2894_v16, %v1810_v21  ;;  %v3150_v1 = vld [vmem:[%s3391_s22 + $0x74] sm:$0x1] }
 0x19d   : > { %2874 = vmatmul.msk.bf16.gmra.mxu1 %vm332_vm1, %v3614_v6  ;;  %2907 = vmatmul.msk.bf16.gmra.mxu2 %vm332_vm1, %v3956_v37  ;;  %v4010_v38 = vadd.f32 %v1472_v17, %v1362_v36  ;;  %v4025_v17 = vpack.c.b16 %v1881_v47, %v1880_v25  ;;  %v4401_v36 = vld [vmem:[#allocation10_spill] sm:$0xff] }
 0x19e   : > { %2925 = vmatmul.msk.bf16.gmra.mxu3 %vm332_vm1, %v3979_v51  ;;  %2943 = vmatmul.msk.bf16.gmra.mxu0 %vm332_vm1, %v4002_v23 }
 0x1a0   : > { %v656_v5 = vpop.f32.mrf.mxu2 }
 0x1a1   : > { %v700_v13 = vadd.f32 %v656_v5, %v555_v32  ;;  %v1319_v6 = vpop.f32.mrf.mxu3  ;;  %v1814_v5 = vsel %vm3500_vm7, %v1812_v20, %v1813_v3  ;;  %v1820_v3 = vrot.slane %v3150_v1, 5 }
 0x1a2   : > { %v556_v18 = vpop.f32.mrf.mxu1 }
 0x1a3   : > { %v1363_v37 = vadd.f32 %v1319_v6, %v700_v13  ;;  %v1477_v8 = vpop.f32.mrf.mxu0  ;;  %v557_v28 = vadd.f32 %v556_v18, %v4399_v46  ;;  %v1882_v6 = vunpack.c.l.b16 %v1811_v43  ;;  %v1883_v18 = vunpack.c.l.b16 %v1814_v5  ;;  %v4405_v43 = vld [vmem:[#allocation14_spill] sm:$0xff] }
 0x1a5   : > { %v4022_v35 = vadd.f32 %v1475_v54, %v1363_v37  ;;  %v4402_v37 = vld [vmem:[#allocation11_spill] sm:$0xff]  ;;  %v4048_v46 = vpack.c.b16 %v1883_v18, %v1882_v6 }
 0x1a8   : > { %v658_v58 = vpop.f32.mrf.mxu2 }
 0x1a9   : > { %v701_v39 = vadd.f32 %v658_v58, %v557_v28  ;;  %v1321_v19 = vpop.f32.mrf.mxu3 }
 0x1aa   : > { %v559_v14 = vpop.f32.mrf.mxu1 }
 0x1ab   : > { %v1364_v48 = vadd.f32 %v1321_v19, %v701_v39  ;;  %v1480_v52 = vpop.f32.mrf.mxu0  ;;  %v560_v54 = vadd.f32 %v559_v14, %v4401_v36  ;;  %v3149_v39 = vld [vmem:[%s3391_s22 + $0x70] sm:$0xf]  ;;  %v1692_v14 = vld [vmem:[%s3391_s22 + $0x6c] sm:$0xe] }
 0x1ac   : > { %v1817_v19 = vrot.slane %v3149_v39, 5  ;;  %v2895_v42 = vrot.slane %v1692_v14, 9  ;;  %v1693_v39 = vld [vmem:[%s3391_s22 + $0x78] sm:$0xe] }
 0x1ad   : > { %2875 = vmatmul.msk.bf16.gmra.mxu1 %vm332_vm1, %v4400_v41  ;;  %2908 = vmatmul.msk.bf16.gmra.mxu2 %vm332_vm1, %v3979_v51  ;;  %v4033_v62 = vadd.f32 %v1477_v8, %v1364_v48  ;;  %v4403_v48 = vld [vmem:[#allocation15_spill] sm:$0xff] }
 0x1ae   : > { %2926 = vmatmul.msk.bf16.gmra.mxu3 %vm332_vm1, %v4002_v23  ;;  %2944 = vmatmul.msk.bf16.gmra.mxu0 %vm332_vm1, %v4025_v17  ;;  %v1819_v41 = vrot.slane %v1817_v19, 4 }
 0x1b0   : > { %v661_v33 = vpop.f32.mrf.mxu2 }
 0x1b1   : > { %v702_v24 = vadd.f32 %v661_v33, %v560_v54  ;;  %v1324_v31 = vpop.f32.mrf.mxu3 }
 0x1b2   : > { %v561_v32 = vpop.f32.mrf.mxu1 }
 0x1b3   : > { %v1365_v51 = vadd.f32 %v1324_v31, %v702_v24  ;;  %v1482_v10 = vpop.f32.mrf.mxu0  ;;  %v562_v8 = vadd.f32 %v561_v32, %v4402_v37  ;;  %v1818_v24 = vsel %vm3500_vm7, %v2895_v42, %v1817_v19  ;;  %v1821_v31 = vsel %vm3500_vm7, %v1819_v41, %v1820_v3  ;;  %v4406_v19 = vld [vmem:[#allocation16_spill] sm:$0xff] }
 0x1b5   : > { %v4045_v13 = vadd.f32 %v1480_v52, %v1365_v51  ;;  %v1884_v51 = vunpack.c.l.b16 %v1818_v24  ;;  %v4407_v24 = vld [vmem:[#allocation17_spill] sm:$0xff] }
 0x1b8   : > { %v663_v60 = vpop.f32.mrf.mxu2 }
 0x1b9   : > { %v703_v34 = vadd.f32 %v663_v60, %v562_v8  ;;  %v1326_v25 = vpop.f32.mrf.mxu3 }
 0x1ba   : > { %v564_v47 = vpop.f32.mrf.mxu1 }
 0x1bb   : > { %v1366_v28 = vadd.f32 %v1326_v25, %v703_v34  ;;  %v1485_v58 = vpop.f32.mrf.mxu0  ;;  %v565_v21 = vadd.f32 %v564_v47, %v4404_v29  ;;  %v3151_v47 = vld [vmem:[%s3391_s22 + $0x7c] sm:$0xf] }
 0x1bd   : > { %2876 = vmatmul.msk.bf16.gmra.mxu1 %vm332_vm1, %v4403_v48  ;;  %2909 = vmatmul.msk.bf16.gmra.mxu2 %vm332_vm1, %v4002_v23  ;;  %v4056_v52 = vadd.f32 %v1482_v10, %v1366_v28  ;;  %v1885_v10 = vunpack.c.l.b16 %v1821_v31  ;;  %v1824_v28 = vrot.slane %v3151_v47, 5  ;;  %v2896_v48 = vrot.slane %v1693_v39, 9  ;;  %v1694_v47 = vld [vmem:[%s3391_s22 + $0x84] sm:$0xe] }
 0x1be   : > { %2927 = vmatmul.msk.bf16.gmra.mxu3 %vm332_vm1, %v4025_v17  ;;  %2945 = vmatmul.msk.bf16.gmra.mxu0 %vm332_vm1, %v4048_v46 }
 0x1bf   : > { %v4071_v60 = vpack.c.b16 %v1885_v10, %v1884_v51  ;;  %v1826_v29 = vrot.slane %v1824_v28, 4 }
 0x1c0   : > { %v666_v36 = vpop.f32.mrf.mxu2 }
 0x1c1   : > { %v704_v54 = vadd.f32 %v666_v36, %v565_v21  ;;  %v1329_v16 = vpop.f32.mrf.mxu3  ;;  %v3152_v21 = vld [vmem:[%s3391_s22 + $0x80] sm:$0x1] }
 0x1c2   : > { %v566_v20 = vpop.f32.mrf.mxu1  ;;  %v1827_v42 = vrot.slane %v3152_v21, 5 }
 0x1c3   : > { %v1367_v23 = vadd.f32 %v1329_v16, %v704_v54  ;;  %v1487_v33 = vpop.f32.mrf.mxu0  ;;  %v567_v5 = vadd.f32 %v566_v20, %v4405_v43  ;;  %v1825_v54 = vsel %vm3500_vm7, %v2896_v48, %v1824_v28  ;;  %v2897_v28 = vrot.slane %v1694_v47, 9  ;;  %v4408_v48 = vld [vmem:[#allocation18_spill] sm:$0xff] }
 0x1c4   : > { %v1828_v16 = vsel %vm3500_vm7, %v1826_v29, %v1827_v42 }
 0x1c5   : > { %v4068_v32 = vadd.f32 %v1485_v58, %v1367_v23  ;;  %v1886_v23 = vunpack.c.l.b16 %v1825_v54  ;;  %v4409_v54 = vld [vmem:[#allocation19_spill] sm:$0xff] }
 0x1c8   : > { %v668_v6 = vpop.f32.mrf.mxu2 }
 0x1c9   : > { %v705_v18 = vadd.f32 %v668_v6, %v567_v5  ;;  %v1331_v37 = vpop.f32.mrf.mxu3 }
 0x1ca   : > { %v569_v8 = vpop.f32.mrf.mxu1 }
 0x1cb   : > { %v1368_v34 = vadd.f32 %v1331_v37, %v705_v18  ;;  %v1490_v25 = vpop.f32.mrf.mxu0  ;;  %v570_v14 = vadd.f32 %v569_v8, %v4406_v19  ;;  %v3153_v8 = vld [vmem:[%s3391_s22 + $0x88] sm:$0xf]  ;;  %v3154_v19 = vld [vmem:[%s3391_s22 + $0x8c] sm:$0x1] }
 0x1cd   : > { %2877 = vmatmul.msk.bf16.gmra.mxu1 %vm332_vm1, %v3711_v9  ;;  %2910 = vmatmul.msk.bf16.gmra.mxu2 %vm332_vm1, %v4025_v17  ;;  %v4079_v58 = vadd.f32 %v1487_v33, %v1368_v34  ;;  %v1887_v33 = vunpack.c.l.b16 %v1828_v16  ;;  %v1831_v34 = vrot.slane %v3153_v8, 5 }
 0x1ce   : > { %2928 = vmatmul.msk.bf16.gmra.mxu3 %vm332_vm1, %v4048_v46  ;;  %2946 = vmatmul.msk.bf16.gmra.mxu0 %vm332_vm1, %v4071_v60 }
 0x1cf   : > { %v4094_v6 = vpack.c.b16 %v1887_v33, %v1886_v23  ;;  %v1833_v39 = vrot.slane %v1831_v34, 4 }
 0x1d0   : > { %v671_v41 = vpop.f32.mrf.mxu2 }
 0x1d1   : > { %v706_v1 = vadd.f32 %v671_v41, %v570_v14  ;;  %v1334_v9 = vpop.f32.mrf.mxu3  ;;  %v1834_v14 = vrot.slane %v3154_v19, 5  ;;  %v3156_v19 = vld [vmem:[%s3391_s22 + $0x98] sm:$0x1] }
 0x1d2   : > { %v571_v3 = vpop.f32.mrf.mxu1 }
 0x1d3   : > { %v1369_v17 = vadd.f32 %v1334_v9, %v706_v1  ;;  %v1492_v36 = vpop.f32.mrf.mxu0  ;;  %v572_v31 = vadd.f32 %v571_v3, %v4407_v24  ;;  %v1832_v1 = vsel %vm3500_vm7, %v2897_v28, %v1831_v34  ;;  %v1835_v9 = vsel %vm3500_vm7, %v1833_v39, %v1834_v14  ;;  %v1695_v34 = vld [vmem:[%s3391_s22 + $0x90] sm:$0xe] }
 0x1d4   : > { %v1841_v14 = vrot.slane %v3156_v19, 5 }
 0x1d5   : > { %v4091_v20 = vadd.f32 %v1490_v25, %v1369_v17  ;;  %v1888_v17 = vunpack.c.l.b16 %v1832_v1 }
 0x1d8   : > { %v673_v51 = vpop.f32.mrf.mxu2 }
 0x1d9   : > { %v707_v10 = vadd.f32 %v673_v51, %v572_v31  ;;  %v1336_v43 = vpop.f32.mrf.mxu3 }
 0x1da   : > { %v1571_v5 = vpop.f32.mrf.mxu1 }
 0x1db   : > { %v1370_v18 = vadd.f32 %v1336_v43, %v707_v10  ;;  %v2258_v37 = vpop.f32.mrf.mxu0  ;;  %v1651_v29 = vadd.f32 %v1571_v5, %v4408_v48  ;;  %v3155_v43 = vld [vmem:[%s3391_s22 + $0x94] sm:$0xf] }
 0x1dc   : > { %v1838_v5 = vrot.slane %v3155_v43, 5 }
 0x1dd   : > { %2878 = vmatmul.msk.bf16.gmra.mxu1 %vm332_vm1, %v3732_v44  ;;  %2911 = vmatmul.msk.bf16.gmra.mxu2 %vm332_vm1, %v4048_v46  ;;  %v4102_v25 = vadd.f32 %v1492_v36, %v1370_v18  ;;  %v1889_v36 = vunpack.c.l.b16 %v1835_v9 }
 0x1de   : > { %2929 = vmatmul.msk.bf16.gmra.mxu3 %vm332_vm1, %v4071_v60  ;;  %2947 = vmatmul.msk.bf16.gmra.mxu0 %vm332_vm1, %v4094_v6  ;;  %v1840_v39 = vrot.slane %v1838_v5, 4 }
 0x1df   : > { %v4118_v10 = vpack.c.b16 %v1889_v36, %v1888_v17 }
 0x1e0   : > { %v1974_v21 = vpop.f32.mrf.mxu2  ;;  %v1842_v17 = vsel %vm3500_vm7, %v1840_v39, %v1841_v14  ;;  %v3158_v14 = vld [vmem:[%s3391_s22 + $0xa4] sm:$0x1] }
 0x1e1   : > { %v2116_v44 = vpop.f32.mrf.mxu3  ;;  %v2054_v42 = vadd.f32 %v1974_v21, %v1651_v29 }
 0x1e2   : > { %v1573_v46 = vpop.f32.mrf.mxu1 }
 0x1e3   : > { %v2260_v41 = vpop.f32.mrf.mxu0  ;;  %v2196_v3 = vadd.f32 %v2116_v44, %v2054_v42  ;;  %v1652_v16 = vadd.f32 %v1573_v46, %v4409_v54  ;;  %v1891_v54 = vunpack.c.l.b16 %v1842_v17 }
 0x1e5   : > { %v2338_v31 = vadd.f32 %v2258_v37, %v2196_v3  ;;  %v2898_v37 = vrot.slane %v1695_v34, 9 }
 0x1e7   : > { %v2472_v28 = vmul.f32 %v2338_v31, %v2338_v31  ;;  %v1839_v3 = vsel %vm3500_vm7, %v2898_v37, %v1838_v5  ;;  %v3157_v5 = vld [vmem:[%s3391_s22 + $0xa0] sm:$0xf] }
 0x1e8   : > { %v1976_v23 = vpop.f32.mrf.mxu2 }
 0x1e9   : > { %v2055_v33 = vadd.f32 %v1976_v23, %v1652_v16  ;;  %v2118_v24 = vpop.f32.mrf.mxu3 }
 0x1ea   : > { %v1576_v51 = vpop.f32.mrf.mxu1 }
 0x1eb   : > { %v2197_v18 = vadd.f32 %v2118_v24, %v2055_v33  ;;  %v2263_v8 = vpop.f32.mrf.mxu0  ;;  %v1653_v44 = vadd.f32 %v1576_v51, %v3752_v53  ;;  %v1890_v53 = vunpack.c.l.b16 %v1839_v3 }
 0x1ed   : > { %v2339_v47 = vadd.f32 %v2260_v41, %v2197_v18  ;;  %2879 = vmatmul.msk.bf16.gmra.mxu1 %vm332_vm1, %v3755_v50  ;;  %2912 = vmatmul.msk.bf16.gmra.mxu2 %vm332_vm1, %v4071_v60  ;;  %v4141_v34 = vpack.c.b16 %v1891_v54, %v1890_v53 }
 0x1ee   : > { %2930 = vmatmul.msk.bf16.gmra.mxu3 %vm332_vm1, %v4094_v6  ;;  %2948 = vmatmul.msk.bf16.gmra.mxu0 %vm332_vm1, %v4118_v10 }
 0x1ef   : > { %v2982_v48 = vpack.c.bf16 %v2339_v47, %v2338_v31  ;;  %v2434_v29 = vadd.f32 %v2339_v47, %v2338_v31  ;;  %v2473_v21 = vmul.f32 %v2339_v47, %v2339_v47  ;;  %v1845_v47 = vrot.slane %v3157_v5, 5 }
 0x1f0   : > { %v1979_v50 = vpop.f32.mrf.mxu2 }
 0x1f1   : > { %v2504_v42 = vadd.f32 %v2473_v21, %v2472_v28  ;;  %v2056_v46 = vadd.f32 %v1979_v50, %v1653_v44  ;;  %v2121_v60 = vpop.f32.mrf.mxu3  ;;  %2983 = vst [vmem:[%s4133_s10] sm:$0xff] %v2982_v48   ;;  %v1847_v19 = vrot.slane %v1845_v47, 4  ;;  %v1848_v48 = vrot.slane %v3158_v14, 5  ;;  %v4410_v50 = vld [vmem:[#allocation20_spill] sm:$0xff]  ;;  %v4412_v14 = vld [vmem:[#allocation23_spill] sm:$0xff] }
 0x1f2   : > { %v1578_v41 = vpop.f32.mrf.mxu1 }
 0x1f3   : > { %v2198_v1 = vadd.f32 %v2121_v60, %v2056_v46  ;;  %v2265_v9 = vpop.f32.mrf.mxu0  ;;  %v1654_v33 = vadd.f32 %v1578_v41, %v3762_v49  ;;  %v1849_v17 = vsel %vm3500_vm7, %v1847_v19, %v1848_v48 }
 0x1f4   : > { %v1893_v54 = vunpack.c.l.b16 %v1849_v17 }
 0x1f5   : > { %v2340_v36 = vadd.f32 %v2263_v8, %v2198_v1  ;;  %v1696_v8 = vld [vmem:[%s3391_s22 + $0x9c] sm:$0xe] }
 0x1f6   : > { %v2899_v49 = vrot.slane %v1696_v8, 9 }
 0x1f7   : > { %v2435_v16 = vadd.f32 %v2434_v29, %v2340_v36  ;;  %v2474_v23 = vmul.f32 %v2340_v36, %v2340_v36 }
 0x1f8   : > { %v1981_v24 = vpop.f32.mrf.mxu2  ;;  %v1846_v3 = vsel %vm3500_vm7, %v2899_v49, %v1845_v47  ;;  %v3159_v47 = vld [vmem:[%s3391_s22 + $0xac] sm:$0xf] }
 0x1f9   : > { %v2505_v31 = vadd.f32 %v2504_v42, %v2474_v23  ;;  %v2057_v51 = vadd.f32 %v1981_v24, %v1654_v33  ;;  %v2123_v43 = vpop.f32.mrf.mxu3  ;;  %v1892_v53 = vunpack.c.l.b16 %v1846_v3  ;;  %v4411_v33 = vld [vmem:[#allocation21_spill] sm:$0xff]  ;;  %v1852_v8 = vrot.slane %v3159_v47, 5 }
 0x1fa   : > { %v1581_v18 = vpop.f32.mrf.mxu1 }
 0x1fb   : > { %v2199_v28 = vadd.f32 %v2123_v43, %v2057_v51  ;;  %v2268_v37 = vpop.f32.mrf.mxu0  ;;  %v1655_v42 = vadd.f32 %v1581_v18, %v4410_v50 }
 0x1fd   : > { %v2341_v39 = vadd.f32 %v2265_v9, %v2199_v28  ;;  %2880 = vmatmul.msk.bf16.gmra.mxu1 %vm332_vm1, %v3778_v7  ;;  %2913 = vmatmul.msk.bf16.gmra.mxu2 %vm332_vm1, %v4094_v6  ;;  %v4161_v28 = vpack.c.b16 %v1893_v54, %v1892_v53 }
 0x1fe   : > { %2931 = vmatmul.msk.bf16.gmra.mxu3 %vm332_vm1, %v4118_v10  ;;  %2949 = vmatmul.msk.bf16.gmra.mxu0 %vm332_vm1, %v4141_v34 }
 0x1ff   : > { %v2987_v29 = vpack.c.bf16 %v2341_v39, %v2340_v36  ;;  %v2436_v21 = vadd.f32 %v2435_v16, %v2341_v39  ;;  %v2475_v44 = vmul.f32 %v2341_v39, %v2341_v39 }
 0x200   : > { %v1984_v7 = vpop.f32.mrf.mxu2 }
 0x201   : > { %v2506_v46 = vadd.f32 %v2505_v31, %v2475_v44  ;;  %v2058_v60 = vadd.f32 %v1984_v7, %v1655_v42  ;;  %v2126_v41 = vpop.f32.mrf.mxu3  ;;  %3059 = vst [vmem:[%s4133_s10 + $0x8] sm:$0xff] %v2987_v29   ;;  %v1854_v29 = vrot.slane %v1852_v8, 4 }
 0x202   : > { %v1583_v6 = vpop.f32.mrf.mxu1 }
 0x203   : > { %v2200_v1 = vadd.f32 %v2126_v41, %v2058_v60  ;;  %v2270_v9 = vpop.f32.mrf.mxu0  ;;  %v1656_v24 = vadd.f32 %v1583_v6, %v4411_v33 }
 0x205   : > { %v2342_v36 = vadd.f32 %v2268_v37, %v2200_v1  ;;  %v1697_v37 = vld [vmem:[%s3391_s22 + $0xa8] sm:$0xe] }
 0x206   : > { %v2900_v48 = vrot.slane %v1697_v37, 9 }
 0x207   : > { %v2437_v16 = vadd.f32 %v2436_v21, %v2342_v36  ;;  %v2476_v23 = vmul.f32 %v2342_v36, %v2342_v36  ;;  %v3160_v21 = vld [vmem:[%s3391_s22 + $0xb0] sm:$0x1] }
 0x208   : > { %v1986_v31 = vpop.f32.mrf.mxu2  ;;  %v1855_v44 = vrot.slane %v3160_v21, 5  ;;  %v1853_v53 = vsel %vm3500_vm7, %v2900_v48, %v1852_v8  ;;  %v3161_v8 = vld [vmem:[%s3391_s22 + $0xb8] sm:$0xf] }
 0x209   : > { %v2507_v51 = vadd.f32 %v2506_v46, %v2476_v23  ;;  %v2059_v43 = vadd.f32 %v1986_v31, %v1656_v24  ;;  %v2128_v18 = vpop.f32.mrf.mxu3  ;;  %v4413_v46 = vld [vmem:[#allocation22_spill] sm:$0xff]  ;;  %v4414_v31 = vld [vmem:[#allocation24_spill] sm:$0xff] }
 0x20a   : > { %v1586_v5 = vpop.f32.mrf.mxu1  ;;  %v1856_v54 = vsel %vm3500_vm7, %v1854_v29, %v1855_v44 }
 0x20b   : > { %v2201_v39 = vadd.f32 %v2128_v18, %v2059_v43  ;;  %v2273_v49 = vpop.f32.mrf.mxu0  ;;  %v1657_v60 = vadd.f32 %v1586_v5, %v4413_v46  ;;  %v1895_v23 = vunpack.c.l.b16 %v1856_v54 }
 0x20d   : > { %v2343_v19 = vadd.f32 %v2270_v9, %v2201_v39  ;;  %2881 = vmatmul.msk.bf16.gmra.mxu1 %vm332_vm1, %v4412_v14  ;;  %2914 = vmatmul.msk.bf16.gmra.mxu2 %vm332_vm1, %v4118_v10 }
 0x20e   : > { %2932 = vmatmul.msk.bf16.gmra.mxu3 %vm332_vm1, %v4141_v34  ;;  %2950 = vmatmul.msk.bf16.gmra.mxu0 %vm332_vm1, %v4161_v28 }
 0x20f   : > { %v2992_v50 = vpack.c.bf16 %v2343_v19, %v2342_v36  ;;  %v2438_v42 = vadd.f32 %v2437_v16, %v2343_v19  ;;  %v2477_v7 = vmul.f32 %v2343_v19, %v2343_v19  ;;  %v1894_v16 = vunpack.c.l.b16 %v1853_v53 }
 0x210   : > { %v1989_v41 = vpop.f32.mrf.mxu2  ;;  %v1859_v19 = vrot.slane %v3161_v8, 5 }
 0x211   : > { %v2508_v6 = vadd.f32 %v2507_v51, %v2477_v7  ;;  %v2060_v1 = vadd.f32 %v1989_v41, %v1657_v60  ;;  %v2131_v9 = vpop.f32.mrf.mxu3  ;;  %3060 = vst [vmem:[%s4133_s10 + $0x10] sm:$0xff] %v2992_v50   ;;  %v4181_v37 = vpack.c.b16 %v1895_v23, %v1894_v16  ;;  %v3162_v50 = vld [vmem:[%s3391_s22 + $0xbc] sm:$0x1]  ;;  %v4415_v41 = vld [vmem:[#allocation25_spill] sm:$0xff] }
 0x212   : > { %v1588_v10 = vpop.f32.mrf.mxu1  ;;  %v1861_v44 = vrot.slane %v1859_v19, 4 }
 0x213   : > { %v2202_v3 = vadd.f32 %v2131_v9, %v2060_v1  ;;  %v2275_v17 = vpop.f32.mrf.mxu0  ;;  %v1658_v51 = vadd.f32 %v1588_v10, %v4414_v31  ;;  %v4416_v31 = vld [vmem:[#allocation26_spill] sm:$0xff] }
 0x215   : > { %v2344_v36 = vadd.f32 %v2273_v49, %v2202_v3  ;;  %v1698_v49 = vld [vmem:[%s3391_s22 + $0xb4] sm:$0xe] }
 0x216   : > { %v2901_v21 = vrot.slane %v1698_v49, 9 }
 0x217   : > { %v2439_v33 = vadd.f32 %v2438_v42, %v2344_v36  ;;  %v2478_v24 = vmul.f32 %v2344_v36, %v2344_v36  ;;  %v1862_v42 = vrot.slane %v3162_v50, 5 }
 0x218   : > { %v1991_v43 = vpop.f32.mrf.mxu2  ;;  %v1860_v53 = vsel %vm3500_vm7, %v2901_v21, %v1859_v19  ;;  %v3163_v19 = vld [vmem:[%s3391_s22 + $0xc4] sm:$0xf] }
 0x219   : > { %v2509_v18 = vadd.f32 %v2508_v6, %v2478_v24  ;;  %v2061_v5 = vadd.f32 %v1991_v43, %v1658_v51  ;;  %v2133_v47 = vpop.f32.mrf.mxu3  ;;  %v1863_v54 = vsel %vm3500_vm7, %v1861_v44, %v1862_v42  ;;  %v1896_v16 = vunpack.c.l.b16 %v1860_v53  ;;  %v3164_v42 = vld [vmem:[%s3391_s22 + $0xc8] sm:$0x1] }
 0x21a   : > { %v1591_v39 = vpop.f32.mrf.mxu1  ;;  %v1897_v23 = vunpack.c.l.b16 %v1863_v54 }
 0x21b   : > { %v2203_v14 = vadd.f32 %v2133_v47, %v2061_v5  ;;  %v2278_v48 = vpop.f32.mrf.mxu0  ;;  %v1659_v6 = vadd.f32 %v1591_v39, %v4415_v41 }
 0x21c   : > { %v4201_v8 = vpack.c.b16 %v1897_v23, %v1896_v16 }
 0x21d   : > { %v2345_v29 = vadd.f32 %v2275_v17, %v2203_v14  ;;  %2882 = vmatmul.msk.bf16.gmra.mxu1 %vm332_vm1, %v3827_v59  ;;  %2915 = vmatmul.msk.bf16.gmra.mxu2 %vm332_vm1, %v4141_v34  ;;  %v2091_v14 = vrot.slane %v3163_v19, 5 }
 0x21e   : > { %2933 = vmatmul.msk.bf16.gmra.mxu3 %vm332_vm1, %v4161_v28  ;;  %2951 = vmatmul.msk.bf16.gmra.mxu0 %vm332_vm1, %v4181_v37 }
 0x21f   : > { %v2997_v7 = vpack.c.bf16 %v2345_v29, %v2344_v36  ;;  %v2440_v46 = vadd.f32 %v2439_v33, %v2345_v29  ;;  %v2479_v60 = vmul.f32 %v2345_v29, %v2345_v29  ;;  %v1699_v29 = vld [vmem:[%s3391_s22 + $0xc0] sm:$0xe]  ;;  %v2093_v50 = vrot.slane %v2091_v14, 4 }
 0x220   : > { %v1994_v59 = vpop.f32.mrf.mxu2  ;;  %v2919_v44 = vrot.slane %v1699_v29, 9 }
 0x221   : > { %v2510_v1 = vadd.f32 %v2509_v18, %v2479_v60  ;;  %v2062_v9 = vadd.f32 %v1994_v59, %v1659_v6  ;;  %v2136_v10 = vpop.f32.mrf.mxu3  ;;  %3061 = vst [vmem:[%s4133_s10 + $0x18] sm:$0xff] %v2997_v7   ;;  %v2094_v7 = vrot.slane %v3164_v42, 5  ;;  %v4217_v59 = vld [vmem:[%s3391_s22 + $0xd0] sm:$0xf] }
 0x222   : > { %v1593_v34 = vpop.f32.mrf.mxu1  ;;  %v1537_v53 = vshll.u32 %v4217_v59, 16  ;;  %v1541_v54 = vshrl.u32 %v4217_v59, 16 }
 0x223   : > { %v2204_v3 = vadd.f32 %v2136_v10, %v2062_v9  ;;  %v2280_v17 = vpop.f32.mrf.mxu0  ;;  %v1660_v51 = vadd.f32 %v1593_v34, %v4416_v31  ;;  %v2095_v23 = vsel %vm3500_vm7, %v2093_v50, %v2094_v7 }
 0x225   : > { %v2346_v36 = vadd.f32 %v2278_v48, %v2204_v3 }
 0x227   : > { %v2441_v33 = vadd.f32 %v2440_v46, %v2346_v36  ;;  %v2480_v24 = vmul.f32 %v2346_v36, %v2346_v36  ;;  %v759_v46 = vld [vmem:[%s3391_s22 + $0xcc] sm:$0xf] }
 0x228   : > { %v1996_v43 = vpop.f32.mrf.mxu2  ;;  %v1528_v34 = vshrl.u32 %v759_v46, 16  ;;  %v1531_v3 = vshll.u32 %v759_v46, 16 }
 0x229   : > { %v2511_v18 = vadd.f32 %v2510_v1, %v2480_v24  ;;  %v2063_v5 = vadd.f32 %v1996_v43, %v1660_v51  ;;  %v2138_v47 = vpop.f32.mrf.mxu3  ;;  %v2099_v43 = vunpack.c.l.b16 %v2095_v23 }
 0x22a   : > { %v1596_v39 = vpop.f32.mrf.mxu1  ;;  %v1530_v24 = vrot.slane %v1528_v34, 4  ;;  %v1533_v31 = vrot.slane %v1531_v3, 5 }
 0x22b   : > { %v2205_v49 = vadd.f32 %v2138_v47, %v2063_v5  ;;  %v2283_v48 = vpop.f32.mrf.mxu0  ;;  %v1539_v5 = vrot.slane %v1537_v53, 5  ;;  %v1543_v47 = vrot.slane %v1541_v54, 4 }
 0x22d   : > { %v2347_v21 = vadd.f32 %v2280_v17, %v2205_v49  ;;  %2883 = vmatmul.msk.bf16.gmra.mxu1 %vm332_vm1, %v3859_v61  ;;  %2916 = vmatmul.msk.bf16.gmra.mxu2 %vm332_vm1, %v4161_v28  ;;  %v1661_v61 = vadd.f32 %v1596_v39, %v3854_v15  ;;  %v2092_v15 = vsel %vm3500_vm7, %v2919_v44, %v2091_v14 }
 0x22e   : > { %2934 = vmatmul.msk.bf16.gmra.mxu3 %vm332_vm1, %v4181_v37  ;;  %2952 = vmatmul.msk.bf16.gmra.mxu0 %vm332_vm1, %v4201_v8  ;;  %v2098_v51 = vunpack.c.l.b16 %v2092_v15  ;;  %v1534_v44 = vor.u32 %v1533_v31, %v1530_v24  ;;  %v1544_v7 = vor.u32 %v1543_v47, %v1539_v5 }
 0x22f   : > { %v3002_v60 = vpack.c.bf16 %v2347_v21, %v2346_v36  ;;  %v2442_v41 = vadd.f32 %v2441_v33, %v2347_v21  ;;  %v2481_v6 = vmul.f32 %v2347_v21, %v2347_v21 }
 0x230   : > { %v1999_v28 = vpop.f32.mrf.mxu2 }
 0x231   : > { %v2512_v1 = vadd.f32 %v2511_v18, %v2481_v6  ;;  %v2064_v9 = vadd.f32 %v1999_v28, %v1661_v61  ;;  %v2141_v10 = vpop.f32.mrf.mxu3  ;;  %3062 = vst [vmem:[%s4133_s10 + $0x20] sm:$0xff] %v3002_v60   ;;  %v761_v18 = vld [vmem:[%s3391_s22 + $0xd4] sm:$0x1]  ;;  %v2233_v60 = vrot.slane %v4217_v59, 5  ;;  %v1700_v28 = vld [vmem:[%s3391_s22 + $0xcc] sm:$0xe] }
 0x232   : > { %v1598_v17 = vpop.f32.mrf.mxu1  ;;  %v1547_v46 = vshll.u32 %v761_v18, 16  ;;  %v2937_v59 = vrot.slane %v1700_v28, 9  ;;  %v2236_v34 = vrot.slane %v761_v18, 5  ;;  %s2563_s22 = sshll.u32 %s4133_s10, 4  ;;  %s2564_s22 = int_to_ptr.vmem [resolvable:$true] %s2563_s22 }
 0x233   : > { %v2206_v36 = vadd.f32 %v2141_v10, %v2064_v9  ;;  %v2285_v16 = vpop.f32.mrf.mxu0  ;;  %v1662_v49 = vadd.f32 %v1598_v17, %v3881_v56  ;;  %v1535_v56 = vrot.slane %v1534_v44, 4  ;;  %v2235_v10 = vrot.slane %v2233_v60, 4 }
 0x235   : > { %v2348_v33 = vadd.f32 %v2283_v48, %v2206_v36  ;;  %v2100_v48 = vpack.c.b16 %v2099_v43, %v2098_v51  ;;  %v1540_v23 = vsel %vm3489_vm4, %v1535_v56, %v1539_v5 }
 0x236   : > { %v1553_v18 = vunpack.c.l.b16 %v1540_v23 }
 0x237   : > { %v2443_v39 = vadd.f32 %v2442_v41, %v2348_v33  ;;  %v2482_v19 = vmul.f32 %v2348_v33, %v2348_v33  ;;  %v1549_v41 = vrot.slane %v1547_v46, 5 }
 0x238   : > { %v2001_v29 = vpop.f32.mrf.mxu2 }
 0x239   : > { %v2513_v21 = vadd.f32 %v2512_v1, %v2482_v19  ;;  %v2065_v42 = vadd.f32 %v2001_v29, %v1662_v49  ;;  %v2143_v14 = vpop.f32.mrf.mxu3  ;;  %v1545_v1 = vrot.slane %v1544_v7, 4 }
 0x23a   : > { %v1601_v50 = vpop.f32.mrf.mxu1 }
 0x23b   : > { %v2207_v6 = vadd.f32 %v2143_v14, %v2065_v42  ;;  %v2288_v61 = vpop.f32.mrf.mxu0  ;;  %v1550_v24 = vsel %vm3489_vm4, %v1545_v1, %v1549_v41 }
 0x23c   : > { %v1554_v47 = vunpack.c.l.b16 %v1550_v24 }
 0x23d   : > { %v2349_v9 = vadd.f32 %v2285_v16, %v2207_v6  ;;  %2884 = vmatmul.msk.bf16.gmra.mxu1 %vm332_vm1, %v3898_v55  ;;  %2917 = vmatmul.msk.bf16.gmra.mxu2 %vm332_vm1, %v4181_v37  ;;  %v1663_v55 = vadd.f32 %v1601_v50, %v3894_v2  ;;  %v2237_v2 = vsel %vm3500_vm7, %v2235_v10, %v2236_v34 }
 0x23e   : > { %2935 = vmatmul.msk.bf16.gmra.mxu3 %vm332_vm1, %v4201_v8  ;;  %2953 = vmatmul.msk.bf16.gmra.mxu0 %vm332_vm1, %v2100_v48  ;;  %v2241_v19 = vunpack.c.l.b16 %v2237_v2  ;;  %v1555_v44 = vpack.c.b16 %v1554_v47, %v1553_v18 }
 0x23f   : > { %v3007_v3 = vpack.c.bf16 %v2349_v9, %v2348_v33  ;;  %v2444_v17 = vadd.f32 %v2443_v39, %v2349_v9  ;;  %v2483_v53 = vmul.f32 %v2349_v9, %v2349_v9  ;;  %v2234_v33 = vsel %vm3500_vm7, %v2937_v59, %v2233_v60 }
 0x240   : > { %v2004_v54 = vpop.f32.mrf.mxu2  ;;  %v2240_v39 = vunpack.c.l.b16 %v2234_v33 }
 0x241   : > { %v2514_v36 = vadd.f32 %v2513_v21, %v2483_v53  ;;  %v2066_v37 = vadd.f32 %v2004_v54, %v1663_v55  ;;  %v2146_v16 = vpop.f32.mrf.mxu3  ;;  %3063 = vst [vmem:[%s4133_s10 + $0x28] sm:$0xff] %v3007_v3  }
 0x242   : > { %v1603_v15 = vpop.f32.mrf.mxu1  ;;  %v2242_v50 = vpack.c.b16 %v2241_v19, %v2240_v39 }
 0x243   : > { %v2208_v31 = vadd.f32 %v2146_v16, %v2066_v37  ;;  %v2290_v51 = vpop.f32.mrf.mxu0  ;;  %v1664_v5 = vadd.f32 %v1603_v15, %v3903_v12 }
 0x245   : > { %v2350_v43 = vadd.f32 %v2288_v61, %v2208_v31 }
 0x247   : > { %v2445_v49 = vadd.f32 %v2444_v17, %v2350_v43  ;;  %v2484_v29 = vmul.f32 %v2350_v43, %v2350_v43 }
 0x248   : > { %v2006_v21 = vpop.f32.mrf.mxu2 }
 0x249   : > { %v2515_v4 = vadd.f32 %v2514_v36, %v2484_v29  ;;  %v2067_v42 = vadd.f32 %v2006_v21, %v1664_v5  ;;  %v2148_v14 = vpop.f32.mrf.mxu3 }
 0x24a   : > { %v1606_v46 = vpop.f32.mrf.mxu1 }
 0x24b   : > { %v2209_v7 = vadd.f32 %v2148_v14, %v2067_v42  ;;  %v2293_v22 = vpop.f32.mrf.mxu0  ;;  %v1665_v28 = vadd.f32 %v1606_v46, %v3910_v26 }
 0x24d   : > { %v2351_v60 = vadd.f32 %v2290_v51, %v2209_v7  ;;  %2885 = vmatmul.msk.bf16.gmra.mxu1 %vm332_vm1, %v1555_v44  ;;  %2918 = vmatmul.msk.bf16.gmra.mxu2 %vm332_vm1, %v4201_v8 }
 0x24e   : > { %2936 = vmatmul.msk.bf16.gmra.mxu3 %vm332_vm1, %v2100_v48  ;;  %2954 = vmatmul.msk.bf16.gmra.mxu0 %vm332_vm1, %v2242_v50 }
 0x24f   : > { %v3012_v12 = vpack.c.bf16 %v2351_v60, %v2350_v43  ;;  %v2446_v6 = vadd.f32 %v2445_v49, %v2351_v60  ;;  %v2485_v61 = vmul.f32 %v2351_v60, %v2351_v60 }
 0x250   : > { %v2009_v9 = vpop.f32.mrf.mxu2 }
 0x251   : > { %v2516_v56 = vadd.f32 %v2515_v4, %v2485_v61  ;;  %v2068_v41 = vadd.f32 %v2009_v9, %v1665_v28  ;;  %v2151_v1 = vpop.f32.mrf.mxu3  ;;  %3064 = vst [vmem:[%s4133_s10 + $0x30] sm:$0xff] %v3012_v12  }
 0x252   : > { %v1608_v59 = vpop.f32.mrf.mxu1 }
 0x253   : > { %v2210_v10 = vadd.f32 %v2151_v1, %v2068_v41  ;;  %v2295_v34 = vpop.f32.mrf.mxu0  ;;  %v1666_v48 = vadd.f32 %v1608_v59, %v3918_v63 }
 0x255   : > { %v2352_v3 = vadd.f32 %v2293_v22, %v2210_v10 }
 0x257   : > { %v2447_v17 = vadd.f32 %v2446_v6, %v2352_v3  ;;  %v2486_v8 = vmul.f32 %v2352_v3, %v2352_v3 }
 0x258   : > { %v2011_v53 = vpop.f32.mrf.mxu2 }
 0x259   : > { %v2517_v55 = vadd.f32 %v2516_v56, %v2486_v8  ;;  %v2069_v54 = vadd.f32 %v2011_v53, %v1666_v48  ;;  %v2153_v36 = vpop.f32.mrf.mxu3 }
 0x25a   : > { %v1611_v37 = vpop.f32.mrf.mxu1 }
 0x25b   : > { %v2211_v26 = vadd.f32 %v2153_v36, %v2069_v54  ;;  %v2298_v16 = vpop.f32.mrf.mxu0  ;;  %v1667_v51 = vadd.f32 %v1611_v37, %v3930_v30 }
 0x25d   : > { %v2353_v15 = vadd.f32 %v2295_v34, %v2211_v26 }
 0x25f   : > { %v3017_v23 = vpack.c.bf16 %v2353_v15, %v2352_v3  ;;  %v2448_v24 = vadd.f32 %v2447_v17, %v2353_v15  ;;  %v2487_v31 = vmul.f32 %v2353_v15, %v2353_v15 }
 0x260   : > { %v2014_v33 = vpop.f32.mrf.mxu2 }
 0x261   : > { %v2518_v2 = vadd.f32 %v2517_v55, %v2487_v31  ;;  %v2070_v43 = vadd.f32 %v2014_v33, %v1667_v51  ;;  %v2156_v18 = vpop.f32.mrf.mxu3  ;;  %3065 = vst [vmem:[%s4133_s10 + $0x38] sm:$0xff] %v3017_v23  }
 0x262   : > { %v1613_v63 = vpop.f32.mrf.mxu1 }
 0x263   : > { %v2212_v47 = vadd.f32 %v2156_v18, %v2070_v43  ;;  %v2300_v39 = vpop.f32.mrf.mxu0  ;;  %v1668_v5 = vadd.f32 %v1613_v63, %v3941_v27 }
 0x265   : > { %v2354_v19 = vadd.f32 %v2298_v16, %v2212_v47 }
 0x267   : > { %v2449_v49 = vadd.f32 %v2448_v24, %v2354_v19  ;;  %v2488_v29 = vmul.f32 %v2354_v19, %v2354_v19 }
 0x268   : > { %v2016_v21 = vpop.f32.mrf.mxu2 }
 0x269   : > { %v2519_v4 = vadd.f32 %v2518_v2, %v2488_v29  ;;  %v2071_v42 = vadd.f32 %v2016_v21, %v1668_v5  ;;  %v2158_v14 = vpop.f32.mrf.mxu3 }
 0x26a   : > { %v1616_v44 = vpop.f32.mrf.mxu1 }
 0x26b   : > { %v2213_v30 = vadd.f32 %v2158_v14, %v2071_v42  ;;  %v2303_v46 = vpop.f32.mrf.mxu0  ;;  %v1669_v12 = vadd.f32 %v1616_v44, %v3953_v57 }
 0x26d   : > { %v2355_v50 = vadd.f32 %v2300_v39, %v2213_v30 }
 0x26f   : > { %v3022_v7 = vpack.c.bf16 %v2355_v50, %v2354_v19  ;;  %v2450_v22 = vadd.f32 %v2449_v49, %v2355_v50  ;;  %v2489_v60 = vmul.f32 %v2355_v50, %v2355_v50 }
 0x270   : > { %v2019_v6 = vpop.f32.mrf.mxu2 }
 0x271   : > { %v2520_v61 = vadd.f32 %v2519_v4, %v2489_v60  ;;  %v2072_v28 = vadd.f32 %v2019_v6, %v1669_v12  ;;  %v2161_v9 = vpop.f32.mrf.mxu3  ;;  %3066 = vst [vmem:[%s4133_s10 + $0x40] sm:$0xff] %v3022_v7  }
 0x272   : > { %v1618_v27 = vpop.f32.mrf.mxu1 }
 0x273   : > { %v2214_v56 = vadd.f32 %v2161_v9, %v2072_v28  ;;  %v2305_v41 = vpop.f32.mrf.mxu0  ;;  %v1670_v34 = vadd.f32 %v1618_v27, %v3964_v0 }
 0x275   : > { %v2356_v1 = vadd.f32 %v2303_v46, %v2214_v56 }
 0x277   : > { %v2451_v59 = vadd.f32 %v2450_v22, %v2356_v1  ;;  %v2490_v10 = vmul.f32 %v2356_v1, %v2356_v1 }
 0x278   : > { %v2021_v3 = vpop.f32.mrf.mxu2 }
 0x279   : > { %v2521_v17 = vadd.f32 %v2520_v61, %v2490_v10  ;;  %v2073_v8 = vadd.f32 %v2021_v3, %v1670_v34  ;;  %v2163_v48 = vpop.f32.mrf.mxu3 }
 0x27a   : > { %v1621_v53 = vpop.f32.mrf.mxu1 }
 0x27b   : > { %v2215_v57 = vadd.f32 %v2163_v48, %v2073_v8  ;;  %v2308_v55 = vpop.f32.mrf.mxu0  ;;  %v1671_v16 = vadd.f32 %v1621_v53, %v3976_v45 }
 0x27d   : > { %v2357_v54 = vadd.f32 %v2305_v41, %v2215_v57 }
 0x27f   : > { %v3027_v36 = vpack.c.bf16 %v2357_v54, %v2356_v1  ;;  %v2452_v37 = vadd.f32 %v2451_v59, %v2357_v54  ;;  %v2491_v26 = vmul.f32 %v2357_v54, %v2357_v54 }
 0x280   : > { %v2024_v15 = vpop.f32.mrf.mxu2 }
 0x281   : > { %v2522_v23 = vadd.f32 %v2521_v17, %v2491_v26  ;;  %v2074_v24 = vadd.f32 %v2024_v15, %v1671_v16  ;;  %v2166_v31 = vpop.f32.mrf.mxu3  ;;  %3067 = vst [vmem:[%s4133_s10 + $0x48] sm:$0xff] %v3027_v36  }
 0x282   : > { %v1623_v0 = vpop.f32.mrf.mxu1 }
 0x283   : > { %v2216_v51 = vadd.f32 %v2166_v31, %v2074_v24  ;;  %v2310_v33 = vpop.f32.mrf.mxu0  ;;  %v1672_v63 = vadd.f32 %v1623_v0, %v3987_v11 }
 0x285   : > { %v2358_v2 = vadd.f32 %v2308_v55, %v2216_v51 }
 0x287   : > { %v2453_v43 = vadd.f32 %v2452_v37, %v2358_v2  ;;  %v2492_v18 = vmul.f32 %v2358_v2, %v2358_v2 }
 0x288   : > { %v2026_v47 = vpop.f32.mrf.mxu2 }
 0x289   : > { %v2523_v39 = vadd.f32 %v2522_v23, %v2492_v18  ;;  %v2075_v19 = vadd.f32 %v2026_v47, %v1672_v63  ;;  %v2168_v49 = vpop.f32.mrf.mxu3 }
 0x28a   : > { %v1626_v29 = vpop.f32.mrf.mxu1 }
 0x28b   : > { %v2217_v45 = vadd.f32 %v2168_v49, %v2075_v19  ;;  %v2313_v5 = vpop.f32.mrf.mxu0  ;;  %v1673_v44 = vadd.f32 %v1626_v29, %v3999_v40 }
 0x28d   : > { %v2359_v21 = vadd.f32 %v2310_v33, %v2217_v45 }
 0x28f   : > { %v3032_v4 = vpack.c.bf16 %v2359_v21, %v2358_v2  ;;  %v2454_v42 = vadd.f32 %v2453_v43, %v2359_v21  ;;  %v2493_v14 = vmul.f32 %v2359_v21, %v2359_v21 }
 0x290   : > { %v2029_v30 = vpop.f32.mrf.mxu2 }
 0x291   : > { %v2524_v46 = vadd.f32 %v2523_v39, %v2493_v14  ;;  %v2076_v50 = vadd.f32 %v2029_v30, %v1673_v44  ;;  %v2171_v7 = vpop.f32.mrf.mxu3  ;;  %3068 = vst [vmem:[%s4133_s10 + $0x50] sm:$0xff] %v3032_v4  }
 0x292   : > { %v1628_v11 = vpop.f32.mrf.mxu1 }
 0x293   : > { %v2218_v22 = vadd.f32 %v2171_v7, %v2076_v50  ;;  %v2315_v60 = vpop.f32.mrf.mxu0  ;;  %v1674_v28 = vadd.f32 %v1628_v11, %v4010_v38 }
 0x295   : > { %v2360_v12 = vadd.f32 %v2313_v5, %v2218_v22 }
 0x297   : > { %v2455_v6 = vadd.f32 %v2454_v42, %v2360_v12  ;;  %v2494_v61 = vmul.f32 %v2360_v12, %v2360_v12 }
 0x298   : > { %v2031_v9 = vpop.f32.mrf.mxu2 }
 0x299   : > { %v2525_v27 = vadd.f32 %v2524_v46, %v2494_v61  ;;  %v2077_v56 = vadd.f32 %v2031_v9, %v1674_v28  ;;  %v2173_v41 = vpop.f32.mrf.mxu3 }
 0x29a   : > { %v1631_v1 = vpop.f32.mrf.mxu1 }
 0x29b   : > { %v2219_v40 = vadd.f32 %v2173_v41, %v2077_v56  ;;  %v2318_v59 = vpop.f32.mrf.mxu0  ;;  %v1675_v8 = vadd.f32 %v1631_v1, %v4022_v35 }
 0x29d   : > { %v2361_v10 = vadd.f32 %v2315_v60, %v2219_v40 }
 0x29f   : > { %v3037_v34 = vpack.c.bf16 %v2361_v10, %v2360_v12  ;;  %v2456_v3 = vadd.f32 %v2455_v6, %v2361_v10  ;;  %v2495_v17 = vmul.f32 %v2361_v10, %v2361_v10 }
 0x2a0   : > { %v2034_v48 = vpop.f32.mrf.mxu2 }
 0x2a1   : > { %v2526_v53 = vadd.f32 %v2525_v27, %v2495_v17  ;;  %v2078_v57 = vadd.f32 %v2034_v48, %v1675_v8  ;;  %v2176_v55 = vpop.f32.mrf.mxu3  ;;  %3069 = vst [vmem:[%s4133_s10 + $0x58] sm:$0xff] %v3037_v34  }
 0x2a2   : > { %v1633_v38 = vpop.f32.mrf.mxu1 }
 0x2a3   : > { %v2220_v54 = vadd.f32 %v2176_v55, %v2078_v57  ;;  %v2320_v36 = vpop.f32.mrf.mxu0  ;;  %v1676_v15 = vadd.f32 %v1633_v38, %v4033_v62 }
 0x2a5   : > { %v2362_v37 = vadd.f32 %v2318_v59, %v2220_v54 }
 0x2a7   : > { %v2457_v26 = vadd.f32 %v2456_v3, %v2362_v37  ;;  %v2496_v16 = vmul.f32 %v2362_v37, %v2362_v37 }
 0x2a8   : > { %v2036_v23 = vpop.f32.mrf.mxu2 }
 0x2a9   : > { %v2527_v24 = vadd.f32 %v2526_v53, %v2496_v16  ;;  %v2079_v31 = vadd.f32 %v2036_v23, %v1676_v15  ;;  %v2178_v0 = vpop.f32.mrf.mxu3 }
 0x2aa   : > { %v1636_v51 = vpop.f32.mrf.mxu1 }
 0x2ab   : > { %v2221_v35 = vadd.f32 %v2178_v0, %v2079_v31  ;;  %v2323_v33 = vpop.f32.mrf.mxu0  ;;  %v1677_v47 = vadd.f32 %v1636_v51, %v4045_v13 }
 0x2ad   : > { %v2363_v2 = vadd.f32 %v2320_v36, %v2221_v35 }
 0x2af   : > { %v3042_v43 = vpack.c.bf16 %v2363_v2, %v2362_v37  ;;  %v2458_v18 = vadd.f32 %v2457_v26, %v2363_v2  ;;  %v2497_v63 = vmul.f32 %v2363_v2, %v2363_v2 }
 0x2b0   : > { %v2039_v39 = vpop.f32.mrf.mxu2 }
 0x2b1   : > { %v2528_v19 = vadd.f32 %v2527_v24, %v2497_v63  ;;  %v2080_v49 = vadd.f32 %v2039_v39, %v1677_v47  ;;  %v2181_v29 = vpop.f32.mrf.mxu3  ;;  %3070 = vst [vmem:[%s4133_s10 + $0x60] sm:$0xff] %v3042_v43  }
 0x2b2   : > { %v1638_v62 = vpop.f32.mrf.mxu1 }
 0x2b3   : > { %v2222_v45 = vadd.f32 %v2181_v29, %v2080_v49  ;;  %v2325_v5 = vpop.f32.mrf.mxu0  ;;  %v1678_v14 = vadd.f32 %v1638_v62, %v4056_v52 }
 0x2b5   : > { %v2364_v21 = vadd.f32 %v2323_v33, %v2222_v45 }
 0x2b7   : > { %v2459_v4 = vadd.f32 %v2458_v18, %v2364_v21  ;;  %v2498_v42 = vmul.f32 %v2364_v21, %v2364_v21 }
 0x2b8   : > { %v2041_v44 = vpop.f32.mrf.mxu2 }
 0x2b9   : > { %v2529_v30 = vadd.f32 %v2528_v19, %v2498_v42  ;;  %v2081_v46 = vadd.f32 %v2041_v44, %v1678_v14  ;;  %v2183_v50 = vpop.f32.mrf.mxu3 }
 0x2ba   : > { %v1641_v7 = vpop.f32.mrf.mxu1 }
 0x2bb   : > { %v2223_v13 = vadd.f32 %v2183_v50, %v2081_v46  ;;  %v2328_v22 = vpop.f32.mrf.mxu0  ;;  %v1679_v61 = vadd.f32 %v1641_v7, %v4068_v32 }
 0x2bd   : > { %v2365_v11 = vadd.f32 %v2325_v5, %v2223_v13 }
 0x2bf   : > { %v3047_v60 = vpack.c.bf16 %v2365_v11, %v2364_v21  ;;  %v2460_v12 = vadd.f32 %v2459_v4, %v2365_v11  ;;  %v2499_v6 = vmul.f32 %v2365_v11, %v2365_v11 }
 0x2c0   : > { %v2044_v28 = vpop.f32.mrf.mxu2 }
 0x2c1   : > { %v2530_v9 = vadd.f32 %v2529_v30, %v2499_v6  ;;  %v2082_v27 = vadd.f32 %v2044_v28, %v1679_v61  ;;  %v2186_v56 = vpop.f32.mrf.mxu3  ;;  %3071 = vst [vmem:[%s4133_s10 + $0x68] sm:$0xff] %v3047_v60  }
 0x2c2   : > { %v1643_v52 = vpop.f32.mrf.mxu1 }
 0x2c3   : > { %v2224_v41 = vadd.f32 %v2186_v56, %v2082_v27  ;;  %v1680_v10 = vadd.f32 %v1643_v52, %v4079_v58  ;;  %v2330_v34 = vpop.f32.mrf.mxu0 }
 0x2c5   : > { %v2366_v1 = vadd.f32 %v2328_v22, %v2224_v41 }
 0x2c7   : > { %v2461_v40 = vadd.f32 %v2460_v12, %v2366_v1  ;;  %v2500_v59 = vmul.f32 %v2366_v1, %v2366_v1 }
 0x2c8   : > { %v2046_v3 = vpop.f32.mrf.mxu2 }
 0x2c9   : > { %v2531_v17 = vadd.f32 %v2530_v9, %v2500_v59  ;;  %v2083_v8 = vadd.f32 %v2046_v3, %v1680_v10  ;;  %v2188_v48 = vpop.f32.mrf.mxu3 }
 0x2ca   : > { %v1646_v53 = vpop.f32.mrf.mxu1 }
 0x2cb   : > { %v2225_v32 = vadd.f32 %v2188_v48, %v2083_v8  ;;  %v1681_v36 = vadd.f32 %v1646_v53, %v4091_v20  ;;  %v2333_v58 = vpop.f32.mrf.mxu0 }
 0x2cd   : > { %v2367_v57 = vadd.f32 %v2330_v34, %v2225_v32 }
 0x2cf   : > { %v3052_v55 = vpack.c.bf16 %v2367_v57, %v2366_v1  ;;  %v2462_v38 = vadd.f32 %v2461_v40, %v2367_v57  ;;  %v2501_v54 = vmul.f32 %v2367_v57, %v2367_v57 }
 0x2d0   : > { %v2049_v37 = vpop.f32.mrf.mxu2 }
 0x2d1   : > { %v2532_v26 = vadd.f32 %v2531_v17, %v2501_v54  ;;  %v2084_v16 = vadd.f32 %v2049_v37, %v1681_v36  ;;  %v2191_v15 = vpop.f32.mrf.mxu3  ;;  %3072 = vst [vmem:[%s4133_s10 + $0x70] sm:$0xff] %v3052_v55  }
 0x2d2   : > { %v1648_v24 = vpop.f32.mrf.mxu1 }
 0x2d3   : > { %v2226_v23 = vadd.f32 %v2191_v15, %v2084_v16  ;;  %v1682_v35 = vadd.f32 %v1648_v24, %v4102_v25  ;;  %v2335_v63 = vpop.f32.mrf.mxu0 }
 0x2d5   : > { %v2368_v31 = vadd.f32 %v2333_v58, %v2226_v23 }
 0x2d7   : > { %v2463_v0 = vadd.f32 %v2462_v38, %v2368_v31  ;;  %v2502_v51 = vmul.f32 %v2368_v31, %v2368_v31 }
 0x2d8   : > { %v2051_v33 = vpop.f32.mrf.mxu2 }
 0x2d9   : > { %v2533_v2 = vadd.f32 %v2532_v26, %v2502_v51  ;;  %v2085_v43 = vadd.f32 %v2051_v33, %v1682_v35  ;;  %v2193_v20 = vpop.f32.mrf.mxu3 }
 0x2db   : > { %v2227_v18 = vadd.f32 %v2193_v20, %v2085_v43 }
 0x2dd   : > { %v2369_v47 = vadd.f32 %v2335_v63, %v2227_v18 }
 0x2df   : > { %v3057_v39 = vpack.c.bf16 %v2369_v47, %v2368_v31  ;;  %v2464_v19 = vadd.f32 %v2463_v0, %v2369_v47  ;;  %v2503_v25 = vmul.f32 %v2369_v47, %v2369_v47 }
 0x2e1   : > { %v2465_v49 = vrot.slane %v2464_v19, 4  ;;  %v2534_v29 = vadd.f32 %v2533_v2, %v2503_v25  ;;  %3073 = vst [vmem:[%s4133_s10 + $0x78] sm:$0xff] %v3057_v39  }
 0x2e2   : > { %3192 = shalt.err (!%p3189_p3)
}
 0x2e3   : > { %s3289_s10 = smov 64   ;;  %s3290_s11 = smov 4   ;;  %v2466_v62 = vadd.f32 %v2465_v49, %v2464_v19  ;;  %v2535_v45 = vrot.slane %v2534_v29, 4 }
 0x2e4   : > { %3078 = dma.vmem_to_hbm [thread:$0]  (%p3356_p5), %s2564_s22, 2048, %s2566_s23, %s2543_s27, %s3289_s10, %s3289_s10, %s3290_s11  }
 0x2e5   : > { %v2536_v5 = vadd.f32 %v2535_v45, %v2534_v29  ;;  %v2467_v21 = vrot.slane %v2466_v62, 2  ;;  %s2577_s14 = scalar_lea.hbm %s4368_s3, %s3337_s19  ;;  %s2547_s28 = sand.u32 1, %s3337_s19  }
 0x2e6   : > { %s2590_s5 = scalar_lea.hbm %s4369_s4, %s3337_s19  ;;  %s200_s6 = scalar_lea.vmem [#allocation4], %s4116_s8 }
 0x2e7   : > { %v2468_v4 = vadd.f32 %v2467_v21, %v2466_v62  ;;  %v2537_v42 = vrot.slane %v2536_v5, 2  ;;  %s4307_s7 = sshll.u32 %s200_s6, 4  ;;  %s4309_s22 = sshll.u32 %s2577_s14, 4  ;;  %s2580_s7 = int_to_ptr.vmem [resolvable:$true] %s4307_s7  ;;  %s2582_s22 = int_to_ptr.hbm [resolvable:$true] %s4309_s22 }
 0x2e8   : > { %s206_s23 = scalar_lea.vmem [#allocation6], %s4116_s8  ;;  %s4314_s9 = sshll.u32 %s2590_s5, 4  ;;  %s2595_s9 = int_to_ptr.hbm [resolvable:$true] %s4314_s9 }
 0x2e9   : > { %v2469_v14 = vrot.slane %v2468_v4, 1  ;;  %v2538_v44 = vadd.f32 %v2537_v42, %v2536_v5  ;;  %s4312_s27 = sshll.u32 %s206_s23, 4  ;;  %s2548_s19 = scalar_lea.sflag [#allocation5], %s2547_s28  ;;  %s2593_s27 = int_to_ptr.vmem [resolvable:$true] %s4312_s27 }
 0x2ea   : > { %s3207_s10 = sshra.s32 %s2582_s22, 4  ;;  %s3213_s13 = scalar_lea.hbm %s4368_s3, 2  ;;  %s3208_s10 = int_to_ptr.hbm [resolvable:$true] %s3207_s10 }
 0x2eb   : > { %v2470_v30 = vadd.f32 %v2469_v14, %v2468_v4  ;;  %v2539_v46 = vrot.slane %v2538_v44, 1  ;;  %s3209_s11 = scalar_lea.hbm %s3208_s10, 1  ;;  %p3214_p9 = scmp.lt.s32.totalorder %s3208_s10, %s4368_s3 }
 0x2ec   : > { %p3210_p4 = scmp.ne.s32.totalorder %s3208_s10, %s3209_s11  ;;  %p3215_p10 = scmp.lt.s32.totalorder %s3213_s13, %s3209_s11 }
 0x2ed   : > { %2471 = vst [vmem:[%s200_s6] sm:$0x1] %v2470_v30  ;;  %v2540_v50 = vadd.f32 %v2539_v46, %v2538_v44 }
 0x2ee   : > { %p3211_p7 = pnand %p3210_p4, %p3356_p5  ;;  %p3216_p11 = por %p3215_p10, %p3214_p9 }
 0x2f0   : > { %p3212_p8 = pneg %p3211_p7 }
 0x2f2   : > { %p3217_p12 = pnand %p3216_p11, %p3212_p8 }
 0x2f4   : > { %3220 = shalt.err (!%p3217_p12)
}
 0x2f5   : > { %3079 = dma.vmem_to_hbm [thread:$0]  (%p3356_p5), %s2580_s7, 16, %s2582_s22, %s2548_s19   ;;  %2541 = vst [vmem:[%s206_s23] sm:$0x1] %v2540_v50 }
 0x2f6   : > { %s3235_s28 = sshra.s32 %s2595_s9, 4  ;;  %s3241_s10 = scalar_lea.hbm %s4369_s4, 2  ;;  %s3236_s28 = int_to_ptr.hbm [resolvable:$true] %s3235_s28 }
 0x2f7   : > { %s3237_s30 = scalar_lea.hbm %s3236_s28, 1  ;;  %p3242_p2 = scmp.lt.s32.totalorder %s3236_s28, %s4369_s4 }
 0x2f8   : > { %p3238_p13 = scmp.ne.s32.totalorder %s3236_s28, %s3237_s30  ;;  %p3243_p3 = scmp.lt.s32.totalorder %s3241_s10, %s3237_s30 }
 0x2fa   : > { %p3239_p0 = pnand %p3238_p13, %p3356_p5  ;;  %p3244_p4 = por %p3243_p3, %p3242_p2 }
 0x2fc   : > { %p3240_p1 = pneg %p3239_p0 }
 0x2fe   : > { %p3245_p7 = pnand %p3244_p4, %p3240_p1 }
 0x300   : > { %3248 = shalt.err (!%p3245_p7)
}
 0x301   : > { %3080 = dma.vmem_to_hbm [thread:$0]  (%p3356_p5), %s2593_s27, 16, %s2595_s9, %s2548_s19  }
 0x302 PF: > { %p3094_p8 = scmp.ge.s32.totalorder %s3287_s18, 2  ;;  %s2606_s7 = sand.u32 1, %s3275_s15  }
 0x303   : > { %s2607_s22 = scalar_lea.sflag [#allocation3], %s2606_s7 }
 0x304   : > { %p3085_p9 = pnand %p3094_p8, %p3360_p6 }
 0x306   : > { %p3086_p10 = pneg %p3085_p9 }
 0x308   : > { %3266 = dma.done.wait (%p3086_p10), %s2607_s22, 2048  }
 0x309   : > { %3268 = vsyncadd (%p3086_p10), %s2607_s22, 4294965248  ;;  %s2616_s25 = sand.u32 1, %s2707_s20  }
 0x30a   : > { %s2617_s23 = scalar_lea.sflag [#allocation5], %s2616_s25 }
 0x30b   : > { %3270 = dma.done.wait (%p3086_p10), %s2617_s23, 32  }
 0x30c   : > { %3272 = vsyncadd (%p3086_p10), %s2617_s23, 4294967264  ;;  %p18_p5 = scmp.ge.s32.totalorder %s3341_s21, 4   ;;  %s4417_s15 = smov %s3279_s16 }
 0x30d   : > { %s4418_s16 = smov %s3283_s17  ;;  %s4419_s17 = smov %s3354_s24 }
 0x30e   : > { %s4420_s18 = smov %s3341_s21  ;;  %20 = sbr.rel (!%p18_p5) target bundleno = 5 (0x5), region = 103 }
 0x313   :  { %2631 = vsyncpa [#allocation3], 1 }
 0x314   :  { %2633 = vsyncpa [#allocation3 + $0x1], 1 }
 0x315   :  { %2634 = vsyncpa [#allocation5], 1 }
 0x316   :  { %2636 = vsyncpa [#allocation5 + $0x1], 1 }

</bundles_post_ra>
